<compile_context>
chip_gen: v6e
topology: v6e:2x2x1
jax: 0.10.0
libtpu: 0.0.40
codegen_flags: <defaults>
</compile_context>

<pallas_src>
import functools

import jax
import jax.numpy as jnp
from jax.experimental import pallas as pl
from jax.experimental.pallas import tpu as pltpu


# ---------------------------------------------------------------------------
# In-kernel helpers (all operate on (C, L) = channels-sublane / length-lane)
# ---------------------------------------------------------------------------

def _leaky_relu(v):
    return jnp.where(v > 0, v, 0.01 * v)          # nn.LeakyReLU default slope


def _shift_lanes(x, off):
    """out[:, j] = x[:, j + off] when 0 <= j + off < L, else 0 (lane shift)."""
    c, l = x.shape
    if off == 0:
        return x
    if abs(off) >= l:
        return jnp.zeros_like(x)
    z = jnp.zeros((c, abs(off)), x.dtype)
    if off > 0:
        return jnp.concatenate([x[:, off:], z], axis=-1)
    return jnp.concatenate([z, x[:, :off]], axis=-1)


def _conv1d_same_cl(h, w_t, b_col, K):
    """'same' 1-D conv (cross-correlation, like nn.Conv1d) as one MXU matmul.

    h:     (Cin, L)       f32 activation (lane-dense)
    w_t:   (Cout, K*Cin)  bf16 weight, column index = k*Cin + c
    b_col: (Cout, 1)      f32 bias
    The im2col slab (K*Cin, L) is built with lane shifts; zero 'same' padding
    falls out of the zero-fill of the shifts.
    """
    pad = K // 2
    parts = [_shift_lanes(h, k - pad) for k in range(K)]
    slab = parts[0] if K == 1 else jnp.concatenate(parts, axis=0)
    y = jnp.dot(w_t, slab.astype(jnp.bfloat16),
                preferred_element_type=jnp.float32)
    return y + b_col


def _semi_global(h, wc_t, bc, we_t, be, K, scale):
    """SemiGlobalBlock in (C, L) layout, fully lane-dense.

    contract_conv -> LeakyReLU -> MaxPool(scale) -> expand_conv -> LeakyReLU
    -> nearest upsample(scale) -> centering pad -> add.
    The pool/upsample pair is folded into (a) a blockwise max broadcast over
    every `scale`-block and (b) a dilation=`scale` conv evaluated directly in
    the full-L domain (upsample commutes with the pooled-domain conv).
    """
    f, l = h.shape
    ls = l // scale
    lv = ls * scale
    p2 = (l - lv) // 2

    s = _leaky_relu(_conv1d_same_cl(h, wc_t, bc, K))           # (Csg, L)
    csg = s.shape[0]

    # sliding max of window `scale` (exact at every block head j = t*scale)
    m = s
    w = 1
    while w < scale:
        d = min(w, scale - w)
        m = jnp.maximum(m, _shift_lanes(m, d))
        w += d

    # broadcast each block head's value to its whole scale-block:
    # after this, m[:, j] == maxpool(s)[:, j // scale] for all j < lv.
    lane = jax.lax.broadcasted_iota(jnp.int32, (csg, l), 1)
    rmod = lane % scale
    d = 1
    while d < scale:
        m = jnp.where((rmod & d) != 0, _shift_lanes(m, -d), m)
        d *= 2

    # expand conv + nearest upsample == dilation=scale conv on m
    pad = K // 2
    parts = []
    for k in range(K):
        off = (k - pad) * scale
        v = _shift_lanes(m, off)
        if lv < l:
            src = lane + off
            v = jnp.where((src >= 0) & (src < lv), v, 0.0)
        parts.append(v)
    slab = jnp.concatenate(parts, axis=0)                      # (K*Csg, L)
    y = jnp.dot(we_t, slab.astype(jnp.bfloat16),
                preferred_element_type=jnp.float32) + be
    y = _leaky_relu(y)                                         # (F, L)

    # centering zero-pad (F.pad(p2, p2)) then residual add
    if p2 > 0 or lv < l:
        lane_f = jax.lax.broadcasted_iota(jnp.int32, (f, l), 1)
        v = _shift_lanes(y, -p2)
        v = jnp.where((lane_f >= p2) & (lane_f < p2 + lv), v, 0.0)
        return h + v
    return h + y


# ---------------------------------------------------------------------------
# Fused StofNet kernel (one grid step = one batch element, full network)
# ---------------------------------------------------------------------------

def _stofnet_kernel(*refs, num_blocks, K0, K1, K2, Ksg, scale,
                    residual_layers, use_sg):
    if use_sg:
        (x_ref, w1_ref, b1_ref, wc_ref, bc_ref, we_ref, be_ref,
         wm_ref, bm_ref, wl_ref, bl_ref, o_ref) = refs
    else:
        (x_ref, w1_ref, b1_ref, wm_ref, bm_ref, wl_ref, bl_ref, o_ref) = refs

    x = x_ref[0].astype(jnp.float32)                           # (Cin, L)

    # --- conv1 + ReLU --------------------------------------------------------
    h = jnp.maximum(_conv1d_same_cl(x, w1_ref[...], b1_ref[...], K0), 0.0)

    # --- SemiGlobalBlock ------------------------------------------------------
    if use_sg:
        h = _semi_global(h, wc_ref[...], bc_ref[...], we_ref[...], be_ref[...],
                         Ksg, scale)

    # --- residual conv chain: conv2 .. conv{num_blocks-1} ---------------------
    res = h
    res1 = h
    for i in range(2, num_blocks - 1):
        y = _conv1d_same_cl(h, wm_ref[i - 2], bm_ref[i - 2], K1)
        if i in residual_layers:
            h = res + y
            res = h
        else:
            h = _leaky_relu(y)
    y = _conv1d_same_cl(h, wm_ref[num_blocks - 3], bm_ref[num_blocks - 3], K1)
    h = res1 + y

    # --- conv_last: lane-dense (r, L) output tile -----------------------------
    y = _conv1d_same_cl(h, wl_ref[...], bl_ref[...], K2)
    o_ref[0] = y.astype(o_ref.dtype)


# ---------------------------------------------------------------------------
# Public forward pass (accepts NCW input like the PyTorch module)
# ---------------------------------------------------------------------------

def stofnet_forward(params, x_ncw, *, num_blocks, upsample_factor,
                    semi_global_scale):
    B, Cin, L = x_ncw.shape
    K0, _, F = params["conv1"]["w"].shape
    n_mid, K1, _, _ = params["mid_w"].shape
    K2 = params["conv_last"]["w"].shape[0]
    Ksg = 5                                   # SemiGlobalBlock kernel_size
    r = upsample_factor
    use_sg = semi_global_scale != 1
    residual_layers = tuple(range(3, num_blocks - 1, 2)) + (num_blocks - 1,
                                                            num_blocks)

    # Weights pre-transposed to (Cout, K*Cin) bf16 matmul form.
    def w_t(w):
        k, ci, co = w.shape
        return jnp.transpose(w.reshape(k * ci, co)).astype(jnp.bfloat16)

    def b_col(b):
        return b.reshape(-1, 1).astype(jnp.float32)

    w1 = w_t(params["conv1"]["w"]); b1 = b_col(params["conv1"]["b"])
    wl = w_t(params["conv_last"]["w"]); bl = b_col(params["conv_last"]["b"])
    wm = jnp.transpose(params["mid_w"].reshape(n_mid, K1 * F, F),
                       (0, 2, 1)).astype(jnp.bfloat16)
    bm = params["mid_b"].reshape(n_mid, F, 1).astype(jnp.float32)

    x = x_ncw.astype(jnp.float32)

    def const_spec(shape):
        nd = len(shape)
        return pl.BlockSpec(shape, lambda *_: (0,) * nd)

    in_specs = [pl.BlockSpec((1, Cin, L), lambda i: (i, 0, 0)),
                const_spec(w1.shape), const_spec(b1.shape)]
    args = [x, w1, b1]

    flops = 2 * L * (F * K0 * Cin + n_mid * F * K1 * F + r * K2 * F)

    if use_sg:
        scale = semi_global_scale
        Ls = L // scale
        if Ls < 1:
            raise ValueError("sequence too short for semi_global_scale")
        if (L - Ls * scale) % 2 != 0:
            # F.pad(padding//2, padding//2) cannot restore length L here;
            # the PyTorch module itself would fail on this shape.
            raise ValueError("L - (L // scale) * scale must be even")
        Csg = params["sg_contract"]["w"].shape[2]
        wc = w_t(params["sg_contract"]["w"]); bc = b_col(params["sg_contract"]["b"])
        we = w_t(params["sg_expand"]["w"]); be = b_col(params["sg_expand"]["b"])
        in_specs += [const_spec(wc.shape), const_spec(bc.shape),
                     const_spec(we.shape), const_spec(be.shape)]
        args += [wc, bc, we, be]
        flops += 2 * L * (Csg * Ksg * F + F * Ksg * Csg)

    in_specs += [const_spec(wm.shape), const_spec(bm.shape),
                 const_spec(wl.shape), const_spec(bl.shape)]
    args += [wm, bm, wl, bl]

    kernel = functools.partial(
        _stofnet_kernel, num_blocks=num_blocks, K0=K0, K1=K1, K2=K2, Ksg=Ksg,
        scale=semi_global_scale, residual_layers=residual_layers,
        use_sg=use_sg)

    bytes_accessed = int(B * r * L * 4 +
                         sum(int(a.size) * a.dtype.itemsize for a in args))
    cost = pl.CostEstimate(flops=int(B * flops), transcendentals=0,
                           bytes_accessed=bytes_accessed)

    out = pl.pallas_call(
        kernel,
        grid=(B,),
        in_specs=in_specs,
        out_specs=pl.BlockSpec((1, r, L), lambda i: (i, 0, 0)),
        out_shape=jax.ShapeDtypeStruct((B, r, L), jnp.float32),
        compiler_params=pltpu.CompilerParams(
            dimension_semantics=("parallel",),
            vmem_limit_bytes=32 * 1024 * 1024),
        cost_estimate=cost,
    )(*args)

    # SampleShuffle1D: out_ncw[b, 0, t*r + k] = conv_last[b, k, t]
    return jnp.transpose(out, (0, 2, 1)).reshape(B, 1, L * r)


# ---------------------------------------------------------------------------
# Synthetic deterministic parameters
# ---------------------------------------------------------------------------

def init_stofnet_params(key, *, in_channels, num_features, num_blocks,
                        kernel_sizes, upsample_factor, semi_global_scale):
    feat_scale = max(1, semi_global_scale // 10)
    csg = feat_scale * num_features
    n_mid = num_blocks - 2

    def conv_param(k, ks, cin, cout, w_scale=0.05):
        k1, k2 = jax.random.split(k)
        w = jax.random.normal(k1, (ks, cin, cout), jnp.float32) * w_scale
        b = jax.random.normal(k2, (cout,), jnp.float32) * 0.01
        return {"w": w, "b": b}

    keys = jax.random.split(key, 6)
    return {
        "conv1": conv_param(keys[0], kernel_sizes[0], in_channels, num_features),
        "sg_contract": conv_param(keys[1], 5, num_features, csg),
        "sg_expand": conv_param(keys[2], 5, csg, num_features),
        "conv_last": conv_param(keys[3], kernel_sizes[2], num_features,
                                upsample_factor),
        "mid_w": jax.random.normal(
            keys[4], (n_mid, kernel_sizes[1], num_features, num_features),
            jnp.float32) * 0.02,
        "mid_b": jax.random.normal(keys[5], (n_mid, num_features),
                                   jnp.float32) * 0.01,
    }


# ---------------------------------------------------------------------------
# Plain-XLA reference (independent code path, NCW like PyTorch)
# ---------------------------------------------------------------------------

def _conv1d_ncw_ref(x, w_kcf, b):
    K = w_kcf.shape[0]
    w_oik = jnp.transpose(w_kcf, (2, 1, 0))            # (Cout, Cin, K)
    y = jax.lax.conv_general_dilated(
        x, w_oik, window_strides=(1,), padding=[(K // 2, K // 2)],
        dimension_numbers=("NCH", "OIH", "NCH"))
    return y + b[None, :, None]


def stofnet_reference(params, x, *, num_blocks, upsample_factor,
                      semi_global_scale):
    h = jax.nn.relu(_conv1d_ncw_ref(x, params["conv1"]["w"],
                                    params["conv1"]["b"]))
    if semi_global_scale != 1:
        scale = semi_global_scale
        s = jax.nn.leaky_relu(_conv1d_ncw_ref(h, params["sg_contract"]["w"],
                                              params["sg_contract"]["b"]))
        B, C, L = s.shape
        Ls = L // scale
        s = jnp.max(s[:, :, :Ls * scale].reshape(B, C, Ls, scale), axis=-1)
        s = jax.nn.leaky_relu(_conv1d_ncw_ref(s, params["sg_expand"]["w"],
                                              params["sg_expand"]["b"]))
        s = jnp.repeat(s, scale, axis=-1)
        p2 = (h.shape[-1] - s.shape[-1]) // 2
        s = jnp.pad(s, ((0, 0), (0, 0), (p2, p2)))
        h = h + s
    residual_layers = list(range(3, num_blocks - 1, 2)) + [num_blocks - 1,
                                                           num_blocks]
    res, res1 = h, h
    for i in range(2, num_blocks - 1):
        y = _conv1d_ncw_ref(h, params["mid_w"][i - 2], params["mid_b"][i - 2])
        if i in residual_layers:
            h = res + y
            res = h
        else:
            h = jax.nn.leaky_relu(y)
    y = _conv1d_ncw_ref(h, params["mid_w"][num_blocks - 3],
                        params["mid_b"][num_blocks - 3])
    h = res1 + y
    y = _conv1d_ncw_ref(h, params["conv_last"]["w"], params["conv_last"]["b"])
    B, r, L = y.shape
    return jnp.transpose(y, (0, 2, 1)).reshape(B, 1, L * r)


# ---------------------------------------------------------------------------
# Demo
# ---------------------------------------------------------------------------

if __name__ == "__main__":
    B, Cin, L = 2, 1, 128
    num_features = 32
    num_blocks = 7
    kernel_sizes = [9, 7, 3]
    upsample_factor = 4
    semi_global_scale = 8            # feat_scale = max(1, 8 // 10) = 1

    key = jax.random.PRNGKey(0)
    kp, kx = jax.random.split(key)
    params = init_stofnet_params(
        kp, in_channels=Cin, num_features=num_features, num_blocks=num_blocks,
        kernel_sizes=kernel_sizes, upsample_factor=upsample_factor,
        semi_global_scale=semi_global_scale)
    x = jax.random.normal(kx, (B, Cin, L), jnp.float32)

    fwd = jax.jit(functools.partial(
        stofnet_forward, num_blocks=num_blocks,
        upsample_factor=upsample_factor,
        semi_global_scale=semi_global_scale))
    out = fwd(params, x)
    jax.block_until_ready(out)

    assert out.shape == (B, 1, L * upsample_factor), out.shape
    assert bool(jnp.all(jnp.isfinite(out)))

    ref = stofnet_reference(params, x, num_blocks=num_blocks,
                            upsample_factor=upsample_factor,
                            semi_global_scale=semi_global_scale)
    err = float(jnp.max(jnp.abs(out - ref)))
    assert err < 2e-2, f"max |kernel - reference| = {err}"

    print("KERNEL_OK")
</pallas_src>

<mosaic_0001>
module attributes {stable_mosaic.version = 11 : i64} {
  func.func @_stofnet_kernel(%arg0: i32, %arg1: memref<1x1x128xf32, #tpu.memory_space<vmem>>, %arg2: memref<32x9xbf16, #tpu.memory_space<vmem>>, %arg3: memref<32x1xf32, #tpu.memory_space<vmem>>, %arg4: memref<32x160xbf16, #tpu.memory_space<vmem>>, %arg5: memref<32x1xf32, #tpu.memory_space<vmem>>, %arg6: memref<32x160xbf16, #tpu.memory_space<vmem>>, %arg7: memref<32x1xf32, #tpu.memory_space<vmem>>, %arg8: memref<5x32x224xbf16, #tpu.memory_space<vmem>>, %arg9: memref<5x32x1xf32, #tpu.memory_space<vmem>>, %arg10: memref<4x96xbf16, #tpu.memory_space<vmem>>, %arg11: memref<4x1xf32, #tpu.memory_space<vmem>>, %arg12: memref<1x4x128xf32, #tpu.memory_space<vmem>>) attributes {dimension_semantics = [#tpu.dimension_semantics<parallel>], iteration_bounds = array<i64: 2>, scalar_prefetch = 0 : i64, scratch_operands = 0 : i64, tpu.core_type = #tpu.core_type<tc>, window_params = [{transform_indices = @transform_0, window_bounds = array<i64: 1, 1, 128>}, {pipeline_mode = #tpu.pipeline_mode<synchronous>, transform_indices = @transform_1, window_bounds = array<i64: 32, 9>}, {pipeline_mode = #tpu.pipeline_mode<synchronous>, transform_indices = @transform_2, window_bounds = array<i64: 32, 1>}, {pipeline_mode = #tpu.pipeline_mode<synchronous>, transform_indices = @transform_3, window_bounds = array<i64: 32, 160>}, {pipeline_mode = #tpu.pipeline_mode<synchronous>, transform_indices = @transform_4, window_bounds = array<i64: 32, 1>}, {pipeline_mode = #tpu.pipeline_mode<synchronous>, transform_indices = @transform_5, window_bounds = array<i64: 32, 160>}, {pipeline_mode = #tpu.pipeline_mode<synchronous>, transform_indices = @transform_6, window_bounds = array<i64: 32, 1>}, {pipeline_mode = #tpu.pipeline_mode<synchronous>, transform_indices = @transform_7, window_bounds = array<i64: 5, 32, 224>}, {pipeline_mode = #tpu.pipeline_mode<synchronous>, transform_indices = @transform_8, window_bounds = array<i64: 5, 32, 1>}, {pipeline_mode = #tpu.pipeline_mode<synchronous>, transform_indices = @transform_9, window_bounds = array<i64: 4, 96>}, {pipeline_mode = #tpu.pipeline_mode<synchronous>, transform_indices = @transform_10, window_bounds = array<i64: 4, 1>}, {transform_indices = @transform_11, window_bounds = array<i64: 1, 4, 128>}]} {
    %c0 = arith.constant 0 : index
    %c0_0 = arith.constant 0 : index
    %c0_1 = arith.constant 0 : index
    %0 = vector.load %arg1[%c0, %c0_0, %c0_1] : memref<1x1x128xf32, #tpu.memory_space<vmem>>, vector<1x1x128xf32>
    %1 = vector.shape_cast %0 : vector<1x1x128xf32> to vector<1x128xf32>
    %c0_2 = arith.constant 0 : index
    %c0_3 = arith.constant 0 : index
    %2 = vector.load %arg2[%c0_2, %c0_3] : memref<32x9xbf16, #tpu.memory_space<vmem>>, vector<32x9xbf16>
    %c0_4 = arith.constant 0 : index
    %c0_5 = arith.constant 0 : index
    %3 = vector.load %arg3[%c0_4, %c0_5] : memref<32x1xf32, #tpu.memory_space<vmem>>, vector<32x1xf32>
    %cst = arith.constant 0.000000e+00 : f32
    %4 = vector.broadcast %cst : f32 to vector<1x4xf32>
    %5 = vector.extract_strided_slice %1 {offsets = [0, 0], sizes = [1, 124], strides = [1, 1]} : vector<1x128xf32> to vector<1x124xf32>
    %6 = tpu.concatenate %4, %5 in 1 : vector<1x4xf32>, vector<1x124xf32> -> vector<1x128xf32>
    %cst_6 = arith.constant 0.000000e+00 : f32
    %7 = vector.broadcast %cst_6 : f32 to vector<1x3xf32>
    %8 = vector.extract_strided_slice %1 {offsets = [0, 0], sizes = [1, 125], strides = [1, 1]} : vector<1x128xf32> to vector<1x125xf32>
    %9 = tpu.concatenate %7, %8 in 1 : vector<1x3xf32>, vector<1x125xf32> -> vector<1x128xf32>
    %cst_7 = arith.constant 0.000000e+00 : f32
    %10 = vector.broadcast %cst_7 : f32 to vector<1x2xf32>
    %11 = vector.extract_strided_slice %1 {offsets = [0, 0], sizes = [1, 126], strides = [1, 1]} : vector<1x128xf32> to vector<1x126xf32>
    %12 = tpu.concatenate %10, %11 in 1 : vector<1x2xf32>, vector<1x126xf32> -> vector<1x128xf32>
    %cst_8 = arith.constant 0.000000e+00 : f32
    %13 = vector.broadcast %cst_8 : f32 to vector<1x1xf32>
    %14 = vector.extract_strided_slice %1 {offsets = [0, 0], sizes = [1, 127], strides = [1, 1]} : vector<1x128xf32> to vector<1x127xf32>
    %15 = tpu.concatenate %13, %14 in 1 : vector<1x1xf32>, vector<1x127xf32> -> vector<1x128xf32>
    %cst_9 = arith.constant 0.000000e+00 : f32
    %16 = vector.broadcast %cst_9 : f32 to vector<1x1xf32>
    %17 = vector.extract_strided_slice %1 {offsets = [0, 1], sizes = [1, 127], strides = [1, 1]} : vector<1x128xf32> to vector<1x127xf32>
    %18 = tpu.concatenate %17, %16 in 1 : vector<1x127xf32>, vector<1x1xf32> -> vector<1x128xf32>
    %cst_10 = arith.constant 0.000000e+00 : f32
    %19 = vector.broadcast %cst_10 : f32 to vector<1x2xf32>
    %20 = vector.extract_strided_slice %1 {offsets = [0, 2], sizes = [1, 126], strides = [1, 1]} : vector<1x128xf32> to vector<1x126xf32>
    %21 = tpu.concatenate %20, %19 in 1 : vector<1x126xf32>, vector<1x2xf32> -> vector<1x128xf32>
    %cst_11 = arith.constant 0.000000e+00 : f32
    %22 = vector.broadcast %cst_11 : f32 to vector<1x3xf32>
    %23 = vector.extract_strided_slice %1 {offsets = [0, 3], sizes = [1, 125], strides = [1, 1]} : vector<1x128xf32> to vector<1x125xf32>
    %24 = tpu.concatenate %23, %22 in 1 : vector<1x125xf32>, vector<1x3xf32> -> vector<1x128xf32>
    %cst_12 = arith.constant 0.000000e+00 : f32
    %25 = vector.broadcast %cst_12 : f32 to vector<1x4xf32>
    %26 = vector.extract_strided_slice %1 {offsets = [0, 4], sizes = [1, 124], strides = [1, 1]} : vector<1x128xf32> to vector<1x124xf32>
    %27 = tpu.concatenate %26, %25 in 1 : vector<1x124xf32>, vector<1x4xf32> -> vector<1x128xf32>
    %28 = tpu.concatenate %6, %9, %12, %15, %1, %18, %21, %24, %27 in 0 : vector<1x128xf32>, vector<1x128xf32>, vector<1x128xf32>, vector<1x128xf32>, vector<1x128xf32>, vector<1x128xf32>, vector<1x128xf32>, vector<1x128xf32>, vector<1x128xf32> -> vector<9x128xf32>
    %29 = arith.truncf %28 : vector<9x128xf32> to vector<9x128xbf16>
    %cst_13 = arith.constant dense<0.000000e+00> : vector<32x128xf32>
    %30 = tpu.matmul %2, %29, %cst_13 {dimension_numbers = #tpu.dot_dimension_numbers<[1], [0], [0], [1], [0, 0, 1, 1], [], []>} : vector<32x9xbf16>, vector<9x128xbf16>, vector<32x128xf32> -> vector<32x128xf32>
    %31 = vector.broadcast %3 : vector<32x1xf32> to vector<32x128xf32>
    %32 = arith.addf %30, %31 : vector<32x128xf32>
    %cst_14 = arith.constant 0.000000e+00 : f32
    %33 = vector.broadcast %cst_14 : f32 to vector<32x128xf32>
    %34 = arith.maximumf %32, %33 : vector<32x128xf32>
    %c0_15 = arith.constant 0 : index
    %c0_16 = arith.constant 0 : index
    %35 = vector.load %arg4[%c0_15, %c0_16] : memref<32x160xbf16, #tpu.memory_space<vmem>>, vector<32x160xbf16>
    %c0_17 = arith.constant 0 : index
    %c0_18 = arith.constant 0 : index
    %36 = vector.load %arg5[%c0_17, %c0_18] : memref<32x1xf32, #tpu.memory_space<vmem>>, vector<32x1xf32>
    %c0_19 = arith.constant 0 : index
    %c0_20 = arith.constant 0 : index
    %37 = vector.load %arg6[%c0_19, %c0_20] : memref<32x160xbf16, #tpu.memory_space<vmem>>, vector<32x160xbf16>
    %c0_21 = arith.constant 0 : index
    %c0_22 = arith.constant 0 : index
    %38 = vector.load %arg7[%c0_21, %c0_22] : memref<32x1xf32, #tpu.memory_space<vmem>>, vector<32x1xf32>
    %cst_23 = arith.constant 0.000000e+00 : f32
    %39 = vector.broadcast %cst_23 : f32 to vector<32x2xf32>
    %40 = vector.extract_strided_slice %34 {offsets = [0, 0], sizes = [32, 126], strides = [1, 1]} : vector<32x128xf32> to vector<32x126xf32>
    %41 = tpu.concatenate %39, %40 in 1 : vector<32x2xf32>, vector<32x126xf32> -> vector<32x128xf32>
    %cst_24 = arith.constant 0.000000e+00 : f32
    %42 = vector.broadcast %cst_24 : f32 to vector<32x1xf32>
    %43 = vector.extract_strided_slice %34 {offsets = [0, 0], sizes = [32, 127], strides = [1, 1]} : vector<32x128xf32> to vector<32x127xf32>
    %44 = tpu.concatenate %42, %43 in 1 : vector<32x1xf32>, vector<32x127xf32> -> vector<32x128xf32>
    %cst_25 = arith.constant 0.000000e+00 : f32
    %45 = vector.broadcast %cst_25 : f32 to vector<32x1xf32>
    %46 = vector.extract_strided_slice %34 {offsets = [0, 1], sizes = [32, 127], strides = [1, 1]} : vector<32x128xf32> to vector<32x127xf32>
    %47 = tpu.concatenate %46, %45 in 1 : vector<32x127xf32>, vector<32x1xf32> -> vector<32x128xf32>
    %cst_26 = arith.constant 0.000000e+00 : f32
    %48 = vector.broadcast %cst_26 : f32 to vector<32x2xf32>
    %49 = vector.extract_strided_slice %34 {offsets = [0, 2], sizes = [32, 126], strides = [1, 1]} : vector<32x128xf32> to vector<32x126xf32>
    %50 = tpu.concatenate %49, %48 in 1 : vector<32x126xf32>, vector<32x2xf32> -> vector<32x128xf32>
    %51 = tpu.concatenate %41, %44, %34, %47, %50 in 0 : vector<32x128xf32>, vector<32x128xf32>, vector<32x128xf32>, vector<32x128xf32>, vector<32x128xf32> -> vector<160x128xf32>
    %52 = arith.truncf %51 : vector<160x128xf32> to vector<160x128xbf16>
    %cst_27 = arith.constant dense<0.000000e+00> : vector<32x128xf32>
    %53 = tpu.matmul %35, %52, %cst_27 {dimension_numbers = #tpu.dot_dimension_numbers<[1], [0], [0], [1], [0, 0, 1, 1], [], []>} : vector<32x160xbf16>, vector<160x128xbf16>, vector<32x128xf32> -> vector<32x128xf32>
    %54 = vector.broadcast %36 : vector<32x1xf32> to vector<32x128xf32>
    %55 = arith.addf %53, %54 : vector<32x128xf32>
    %cst_28 = arith.constant 0.000000e+00 : f32
    %56 = vector.broadcast %cst_28 : f32 to vector<32x128xf32>
    %57 = arith.cmpf ogt, %55, %56 : vector<32x128xf32>
    %cst_29 = arith.constant 0.00999999977 : f32
    %58 = vector.broadcast %cst_29 : f32 to vector<32x128xf32>
    %59 = arith.mulf %58, %55 : vector<32x128xf32>
    %60 = arith.select %57, %55, %59 : vector<32x128xi1>, vector<32x128xf32>
    %cst_30 = arith.constant 0.000000e+00 : f32
    %61 = vector.broadcast %cst_30 : f32 to vector<32x1xf32>
    %62 = vector.extract_strided_slice %60 {offsets = [0, 1], sizes = [32, 127], strides = [1, 1]} : vector<32x128xf32> to vector<32x127xf32>
    %63 = tpu.concatenate %62, %61 in 1 : vector<32x127xf32>, vector<32x1xf32> -> vector<32x128xf32>
    %64 = arith.maximumf %60, %63 : vector<32x128xf32>
    %cst_31 = arith.constant 0.000000e+00 : f32
    %65 = vector.broadcast %cst_31 : f32 to vector<32x2xf32>
    %66 = vector.extract_strided_slice %64 {offsets = [0, 2], sizes = [32, 126], strides = [1, 1]} : vector<32x128xf32> to vector<32x126xf32>
    %67 = tpu.concatenate %66, %65 in 1 : vector<32x126xf32>, vector<32x2xf32> -> vector<32x128xf32>
    %68 = arith.maximumf %64, %67 : vector<32x128xf32>
    %cst_32 = arith.constant 0.000000e+00 : f32
    %69 = vector.broadcast %cst_32 : f32 to vector<32x4xf32>
    %70 = vector.extract_strided_slice %68 {offsets = [0, 4], sizes = [32, 124], strides = [1, 1]} : vector<32x128xf32> to vector<32x124xf32>
    %71 = tpu.concatenate %70, %69 in 1 : vector<32x124xf32>, vector<32x4xf32> -> vector<32x128xf32>
    %72 = arith.maximumf %68, %71 : vector<32x128xf32>
    %73 = tpu.iota {dimensions = array<i32: 1>} : vector<32x128xi32>
    %c8_i32 = arith.constant 8 : i32
    %c0_i32 = arith.constant 0 : i32
    %74 = arith.cmpi eq, %c8_i32, %c0_i32 : i32
    %c1_i32 = arith.constant 1 : i32
    %75 = arith.select %74, %c1_i32, %c8_i32 : i32
    %76 = vector.broadcast %75 : i32 to vector<32x128xi32>
    %77 = arith.remsi %73, %76 : vector<32x128xi32>
    %c0_i32_33 = arith.constant 0 : i32
    %78 = vector.broadcast %c0_i32_33 : i32 to vector<32x128xi32>
    %79 = arith.cmpi ne, %77, %78 : vector<32x128xi32>
    %c0_i32_34 = arith.constant 0 : i32
    %80 = vector.broadcast %c0_i32_34 : i32 to vector<32x128xi32>
    %81 = arith.cmpi slt, %77, %80 : vector<32x128xi32>
    %c0_i32_35 = arith.constant 0 : i32
    %82 = arith.cmpi slt, %75, %c0_i32_35 : i32
    %83 = vector.broadcast %82 : i1 to vector<32x128xi1>
    %84 = vector.broadcast %83 : vector<32x128xi1> to vector<32x128xi1>
    %85 = arith.xori %81, %84 : vector<32x128xi1>
    %86 = arith.andi %85, %79 : vector<32x128xi1>
    %87 = vector.broadcast %75 : i32 to vector<32x128xi32>
    %88 = arith.addi %77, %87 : vector<32x128xi32>
    %89 = arith.select %86, %88, %77 : vector<32x128xi1>, vector<32x128xi32>
    %c1_i32_36 = arith.constant 1 : i32
    %90 = vector.broadcast %c1_i32_36 : i32 to vector<32x128xi32>
    %91 = arith.andi %89, %90 : vector<32x128xi32>
    %c0_i32_37 = arith.constant 0 : i32
    %92 = vector.broadcast %c0_i32_37 : i32 to vector<32x128xi32>
    %93 = arith.cmpi ne, %91, %92 : vector<32x128xi32>
    %cst_38 = arith.constant 0.000000e+00 : f32
    %94 = vector.broadcast %cst_38 : f32 to vector<32x1xf32>
    %95 = vector.extract_strided_slice %72 {offsets = [0, 0], sizes = [32, 127], strides = [1, 1]} : vector<32x128xf32> to vector<32x127xf32>
    %96 = tpu.concatenate %94, %95 in 1 : vector<32x1xf32>, vector<32x127xf32> -> vector<32x128xf32>
    %97 = arith.select %93, %96, %72 : vector<32x128xi1>, vector<32x128xf32>
    %c2_i32 = arith.constant 2 : i32
    %98 = vector.broadcast %c2_i32 : i32 to vector<32x128xi32>
    %99 = arith.andi %89, %98 : vector<32x128xi32>
    %c0_i32_39 = arith.constant 0 : i32
    %100 = vector.broadcast %c0_i32_39 : i32 to vector<32x128xi32>
    %101 = arith.cmpi ne, %99, %100 : vector<32x128xi32>
    %cst_40 = arith.constant 0.000000e+00 : f32
    %102 = vector.broadcast %cst_40 : f32 to vector<32x2xf32>
    %103 = vector.extract_strided_slice %97 {offsets = [0, 0], sizes = [32, 126], strides = [1, 1]} : vector<32x128xf32> to vector<32x126xf32>
    %104 = tpu.concatenate %102, %103 in 1 : vector<32x2xf32>, vector<32x126xf32> -> vector<32x128xf32>
    %105 = arith.select %101, %104, %97 : vector<32x128xi1>, vector<32x128xf32>
    %c4_i32 = arith.constant 4 : i32
    %106 = vector.broadcast %c4_i32 : i32 to vector<32x128xi32>
    %107 = arith.andi %89, %106 : vector<32x128xi32>
    %c0_i32_41 = arith.constant 0 : i32
    %108 = vector.broadcast %c0_i32_41 : i32 to vector<32x128xi32>
    %109 = arith.cmpi ne, %107, %108 : vector<32x128xi32>
    %cst_42 = arith.constant 0.000000e+00 : f32
    %110 = vector.broadcast %cst_42 : f32 to vector<32x4xf32>
    %111 = vector.extract_strided_slice %105 {offsets = [0, 0], sizes = [32, 124], strides = [1, 1]} : vector<32x128xf32> to vector<32x124xf32>
    %112 = tpu.concatenate %110, %111 in 1 : vector<32x4xf32>, vector<32x124xf32> -> vector<32x128xf32>
    %113 = arith.select %109, %112, %105 : vector<32x128xi1>, vector<32x128xf32>
    %cst_43 = arith.constant 0.000000e+00 : f32
    %114 = vector.broadcast %cst_43 : f32 to vector<32x16xf32>
    %115 = vector.extract_strided_slice %113 {offsets = [0, 0], sizes = [32, 112], strides = [1, 1]} : vector<32x128xf32> to vector<32x112xf32>
    %116 = tpu.concatenate %114, %115 in 1 : vector<32x16xf32>, vector<32x112xf32> -> vector<32x128xf32>
    %cst_44 = arith.constant 0.000000e+00 : f32
    %117 = vector.broadcast %cst_44 : f32 to vector<32x8xf32>
    %118 = vector.extract_strided_slice %113 {offsets = [0, 0], sizes = [32, 120], strides = [1, 1]} : vector<32x128xf32> to vector<32x120xf32>
    %119 = tpu.concatenate %117, %118 in 1 : vector<32x8xf32>, vector<32x120xf32> -> vector<32x128xf32>
    %cst_45 = arith.constant 0.000000e+00 : f32
    %120 = vector.broadcast %cst_45 : f32 to vector<32x8xf32>
    %121 = vector.extract_strided_slice %113 {offsets = [0, 8], sizes = [32, 120], strides = [1, 1]} : vector<32x128xf32> to vector<32x120xf32>
    %122 = tpu.concatenate %121, %120 in 1 : vector<32x120xf32>, vector<32x8xf32> -> vector<32x128xf32>
    %cst_46 = arith.constant 0.000000e+00 : f32
    %123 = vector.broadcast %cst_46 : f32 to vector<32x16xf32>
    %124 = vector.extract_strided_slice %113 {offsets = [0, 16], sizes = [32, 112], strides = [1, 1]} : vector<32x128xf32> to vector<32x112xf32>
    %125 = tpu.concatenate %124, %123 in 1 : vector<32x112xf32>, vector<32x16xf32> -> vector<32x128xf32>
    %126 = tpu.concatenate %116, %119, %113, %122, %125 in 0 : vector<32x128xf32>, vector<32x128xf32>, vector<32x128xf32>, vector<32x128xf32>, vector<32x128xf32> -> vector<160x128xf32>
    %127 = arith.truncf %126 : vector<160x128xf32> to vector<160x128xbf16>
    %cst_47 = arith.constant dense<0.000000e+00> : vector<32x128xf32>
    %128 = tpu.matmul %37, %127, %cst_47 {dimension_numbers = #tpu.dot_dimension_numbers<[1], [0], [0], [1], [0, 0, 1, 1], [], []>} : vector<32x160xbf16>, vector<160x128xbf16>, vector<32x128xf32> -> vector<32x128xf32>
    %129 = vector.broadcast %38 : vector<32x1xf32> to vector<32x128xf32>
    %130 = arith.addf %128, %129 : vector<32x128xf32>
    %cst_48 = arith.constant 0.000000e+00 : f32
    %131 = vector.broadcast %cst_48 : f32 to vector<32x128xf32>
    %132 = arith.cmpf ogt, %130, %131 : vector<32x128xf32>
    %cst_49 = arith.constant 0.00999999977 : f32
    %133 = vector.broadcast %cst_49 : f32 to vector<32x128xf32>
    %134 = arith.mulf %133, %130 : vector<32x128xf32>
    %135 = arith.select %132, %130, %134 : vector<32x128xi1>, vector<32x128xf32>
    %136 = arith.addf %34, %135 : vector<32x128xf32>
    %c0_50 = arith.constant 0 : index
    %c0_51 = arith.constant 0 : index
    %c0_52 = arith.constant 0 : index
    %137 = vector.load %arg8[%c0_50, %c0_51, %c0_52] : memref<5x32x224xbf16, #tpu.memory_space<vmem>>, vector<1x32x224xbf16>
    %138 = vector.shape_cast %137 : vector<1x32x224xbf16> to vector<32x224xbf16>
    %c0_53 = arith.constant 0 : index
    %c0_54 = arith.constant 0 : index
    %c0_55 = arith.constant 0 : index
    %139 = vector.load %arg9[%c0_53, %c0_54, %c0_55] : memref<5x32x1xf32, #tpu.memory_space<vmem>>, vector<1x32x1xf32>
    %140 = vector.shape_cast %139 : vector<1x32x1xf32> to vector<32x1xf32>
    %cst_56 = arith.constant 0.000000e+00 : f32
    %141 = vector.broadcast %cst_56 : f32 to vector<32x3xf32>
    %142 = vector.extract_strided_slice %136 {offsets = [0, 0], sizes = [32, 125], strides = [1, 1]} : vector<32x128xf32> to vector<32x125xf32>
    %143 = tpu.concatenate %141, %142 in 1 : vector<32x3xf32>, vector<32x125xf32> -> vector<32x128xf32>
    %cst_57 = arith.constant 0.000000e+00 : f32
    %144 = vector.broadcast %cst_57 : f32 to vector<32x2xf32>
    %145 = vector.extract_strided_slice %136 {offsets = [0, 0], sizes = [32, 126], strides = [1, 1]} : vector<32x128xf32> to vector<32x126xf32>
    %146 = tpu.concatenate %144, %145 in 1 : vector<32x2xf32>, vector<32x126xf32> -> vector<32x128xf32>
    %cst_58 = arith.constant 0.000000e+00 : f32
    %147 = vector.broadcast %cst_58 : f32 to vector<32x1xf32>
    %148 = vector.extract_strided_slice %136 {offsets = [0, 0], sizes = [32, 127], strides = [1, 1]} : vector<32x128xf32> to vector<32x127xf32>
    %149 = tpu.concatenate %147, %148 in 1 : vector<32x1xf32>, vector<32x127xf32> -> vector<32x128xf32>
    %cst_59 = arith.constant 0.000000e+00 : f32
    %150 = vector.broadcast %cst_59 : f32 to vector<32x1xf32>
    %151 = vector.extract_strided_slice %136 {offsets = [0, 1], sizes = [32, 127], strides = [1, 1]} : vector<32x128xf32> to vector<32x127xf32>
    %152 = tpu.concatenate %151, %150 in 1 : vector<32x127xf32>, vector<32x1xf32> -> vector<32x128xf32>
    %cst_60 = arith.constant 0.000000e+00 : f32
    %153 = vector.broadcast %cst_60 : f32 to vector<32x2xf32>
    %154 = vector.extract_strided_slice %136 {offsets = [0, 2], sizes = [32, 126], strides = [1, 1]} : vector<32x128xf32> to vector<32x126xf32>
    %155 = tpu.concatenate %154, %153 in 1 : vector<32x126xf32>, vector<32x2xf32> -> vector<32x128xf32>
    %cst_61 = arith.constant 0.000000e+00 : f32
    %156 = vector.broadcast %cst_61 : f32 to vector<32x3xf32>
    %157 = vector.extract_strided_slice %136 {offsets = [0, 3], sizes = [32, 125], strides = [1, 1]} : vector<32x128xf32> to vector<32x125xf32>
    %158 = tpu.concatenate %157, %156 in 1 : vector<32x125xf32>, vector<32x3xf32> -> vector<32x128xf32>
    %159 = tpu.concatenate %143, %146, %149, %136, %152, %155, %158 in 0 : vector<32x128xf32>, vector<32x128xf32>, vector<32x128xf32>, vector<32x128xf32>, vector<32x128xf32>, vector<32x128xf32>, vector<32x128xf32> -> vector<224x128xf32>
    %160 = arith.truncf %159 : vector<224x128xf32> to vector<224x128xbf16>
    %cst_62 = arith.constant dense<0.000000e+00> : vector<32x128xf32>
    %161 = tpu.matmul %138, %160, %cst_62 {dimension_numbers = #tpu.dot_dimension_numbers<[1], [0], [0], [1], [0, 0, 1, 1], [], []>} : vector<32x224xbf16>, vector<224x128xbf16>, vector<32x128xf32> -> vector<32x128xf32>
    %162 = vector.broadcast %140 : vector<32x1xf32> to vector<32x128xf32>
    %163 = arith.addf %161, %162 : vector<32x128xf32>
    %cst_63 = arith.constant 0.000000e+00 : f32
    %164 = vector.broadcast %cst_63 : f32 to vector<32x128xf32>
    %165 = arith.cmpf ogt, %163, %164 : vector<32x128xf32>
    %cst_64 = arith.constant 0.00999999977 : f32
    %166 = vector.broadcast %cst_64 : f32 to vector<32x128xf32>
    %167 = arith.mulf %166, %163 : vector<32x128xf32>
    %168 = arith.select %165, %163, %167 : vector<32x128xi1>, vector<32x128xf32>
    %c1 = arith.constant 1 : index
    %c0_65 = arith.constant 0 : index
    %c0_66 = arith.constant 0 : index
    %169 = vector.load %arg8[%c1, %c0_65, %c0_66] : memref<5x32x224xbf16, #tpu.memory_space<vmem>>, vector<1x32x224xbf16>
    %170 = vector.shape_cast %169 : vector<1x32x224xbf16> to vector<32x224xbf16>
    %c1_67 = arith.constant 1 : index
    %c0_68 = arith.constant 0 : index
    %c0_69 = arith.constant 0 : index
    %171 = vector.load %arg9[%c1_67, %c0_68, %c0_69] : memref<5x32x1xf32, #tpu.memory_space<vmem>>, vector<1x32x1xf32>
    %172 = vector.shape_cast %171 : vector<1x32x1xf32> to vector<32x1xf32>
    %cst_70 = arith.constant 0.000000e+00 : f32
    %173 = vector.broadcast %cst_70 : f32 to vector<32x3xf32>
    %174 = vector.extract_strided_slice %168 {offsets = [0, 0], sizes = [32, 125], strides = [1, 1]} : vector<32x128xf32> to vector<32x125xf32>
    %175 = tpu.concatenate %173, %174 in 1 : vector<32x3xf32>, vector<32x125xf32> -> vector<32x128xf32>
    %cst_71 = arith.constant 0.000000e+00 : f32
    %176 = vector.broadcast %cst_71 : f32 to vector<32x2xf32>
    %177 = vector.extract_strided_slice %168 {offsets = [0, 0], sizes = [32, 126], strides = [1, 1]} : vector<32x128xf32> to vector<32x126xf32>
    %178 = tpu.concatenate %176, %177 in 1 : vector<32x2xf32>, vector<32x126xf32> -> vector<32x128xf32>
    %cst_72 = arith.constant 0.000000e+00 : f32
    %179 = vector.broadcast %cst_72 : f32 to vector<32x1xf32>
    %180 = vector.extract_strided_slice %168 {offsets = [0, 0], sizes = [32, 127], strides = [1, 1]} : vector<32x128xf32> to vector<32x127xf32>
    %181 = tpu.concatenate %179, %180 in 1 : vector<32x1xf32>, vector<32x127xf32> -> vector<32x128xf32>
    %cst_73 = arith.constant 0.000000e+00 : f32
    %182 = vector.broadcast %cst_73 : f32 to vector<32x1xf32>
    %183 = vector.extract_strided_slice %168 {offsets = [0, 1], sizes = [32, 127], strides = [1, 1]} : vector<32x128xf32> to vector<32x127xf32>
    %184 = tpu.concatenate %183, %182 in 1 : vector<32x127xf32>, vector<32x1xf32> -> vector<32x128xf32>
    %cst_74 = arith.constant 0.000000e+00 : f32
    %185 = vector.broadcast %cst_74 : f32 to vector<32x2xf32>
    %186 = vector.extract_strided_slice %168 {offsets = [0, 2], sizes = [32, 126], strides = [1, 1]} : vector<32x128xf32> to vector<32x126xf32>
    %187 = tpu.concatenate %186, %185 in 1 : vector<32x126xf32>, vector<32x2xf32> -> vector<32x128xf32>
    %cst_75 = arith.constant 0.000000e+00 : f32
    %188 = vector.broadcast %cst_75 : f32 to vector<32x3xf32>
    %189 = vector.extract_strided_slice %168 {offsets = [0, 3], sizes = [32, 125], strides = [1, 1]} : vector<32x128xf32> to vector<32x125xf32>
    %190 = tpu.concatenate %189, %188 in 1 : vector<32x125xf32>, vector<32x3xf32> -> vector<32x128xf32>
    %191 = tpu.concatenate %175, %178, %181, %168, %184, %187, %190 in 0 : vector<32x128xf32>, vector<32x128xf32>, vector<32x128xf32>, vector<32x128xf32>, vector<32x128xf32>, vector<32x128xf32>, vector<32x128xf32> -> vector<224x128xf32>
    %192 = arith.truncf %191 : vector<224x128xf32> to vector<224x128xbf16>
    %cst_76 = arith.constant dense<0.000000e+00> : vector<32x128xf32>
    %193 = tpu.matmul %170, %192, %cst_76 {dimension_numbers = #tpu.dot_dimension_numbers<[1], [0], [0], [1], [0, 0, 1, 1], [], []>} : vector<32x224xbf16>, vector<224x128xbf16>, vector<32x128xf32> -> vector<32x128xf32>
    %194 = vector.broadcast %172 : vector<32x1xf32> to vector<32x128xf32>
    %195 = arith.addf %193, %194 : vector<32x128xf32>
    %196 = arith.addf %136, %195 : vector<32x128xf32>
    %c2 = arith.constant 2 : index
    %c0_77 = arith.constant 0 : index
    %c0_78 = arith.constant 0 : index
    %197 = vector.load %arg8[%c2, %c0_77, %c0_78] : memref<5x32x224xbf16, #tpu.memory_space<vmem>>, vector<1x32x224xbf16>
    %198 = vector.shape_cast %197 : vector<1x32x224xbf16> to vector<32x224xbf16>
    %c2_79 = arith.constant 2 : index
    %c0_80 = arith.constant 0 : index
    %c0_81 = arith.constant 0 : index
    %199 = vector.load %arg9[%c2_79, %c0_80, %c0_81] : memref<5x32x1xf32, #tpu.memory_space<vmem>>, vector<1x32x1xf32>
    %200 = vector.shape_cast %199 : vector<1x32x1xf32> to vector<32x1xf32>
    %cst_82 = arith.constant 0.000000e+00 : f32
    %201 = vector.broadcast %cst_82 : f32 to vector<32x3xf32>
    %202 = vector.extract_strided_slice %196 {offsets = [0, 0], sizes = [32, 125], strides = [1, 1]} : vector<32x128xf32> to vector<32x125xf32>
    %203 = tpu.concatenate %201, %202 in 1 : vector<32x3xf32>, vector<32x125xf32> -> vector<32x128xf32>
    %cst_83 = arith.constant 0.000000e+00 : f32
    %204 = vector.broadcast %cst_83 : f32 to vector<32x2xf32>
    %205 = vector.extract_strided_slice %196 {offsets = [0, 0], sizes = [32, 126], strides = [1, 1]} : vector<32x128xf32> to vector<32x126xf32>
    %206 = tpu.concatenate %204, %205 in 1 : vector<32x2xf32>, vector<32x126xf32> -> vector<32x128xf32>
    %cst_84 = arith.constant 0.000000e+00 : f32
    %207 = vector.broadcast %cst_84 : f32 to vector<32x1xf32>
    %208 = vector.extract_strided_slice %196 {offsets = [0, 0], sizes = [32, 127], strides = [1, 1]} : vector<32x128xf32> to vector<32x127xf32>
    %209 = tpu.concatenate %207, %208 in 1 : vector<32x1xf32>, vector<32x127xf32> -> vector<32x128xf32>
    %cst_85 = arith.constant 0.000000e+00 : f32
    %210 = vector.broadcast %cst_85 : f32 to vector<32x1xf32>
    %211 = vector.extract_strided_slice %196 {offsets = [0, 1], sizes = [32, 127], strides = [1, 1]} : vector<32x128xf32> to vector<32x127xf32>
    %212 = tpu.concatenate %211, %210 in 1 : vector<32x127xf32>, vector<32x1xf32> -> vector<32x128xf32>
    %cst_86 = arith.constant 0.000000e+00 : f32
    %213 = vector.broadcast %cst_86 : f32 to vector<32x2xf32>
    %214 = vector.extract_strided_slice %196 {offsets = [0, 2], sizes = [32, 126], strides = [1, 1]} : vector<32x128xf32> to vector<32x126xf32>
    %215 = tpu.concatenate %214, %213 in 1 : vector<32x126xf32>, vector<32x2xf32> -> vector<32x128xf32>
    %cst_87 = arith.constant 0.000000e+00 : f32
    %216 = vector.broadcast %cst_87 : f32 to vector<32x3xf32>
    %217 = vector.extract_strided_slice %196 {offsets = [0, 3], sizes = [32, 125], strides = [1, 1]} : vector<32x128xf32> to vector<32x125xf32>
    %218 = tpu.concatenate %217, %216 in 1 : vector<32x125xf32>, vector<32x3xf32> -> vector<32x128xf32>
    %219 = tpu.concatenate %203, %206, %209, %196, %212, %215, %218 in 0 : vector<32x128xf32>, vector<32x128xf32>, vector<32x128xf32>, vector<32x128xf32>, vector<32x128xf32>, vector<32x128xf32>, vector<32x128xf32> -> vector<224x128xf32>
    %220 = arith.truncf %219 : vector<224x128xf32> to vector<224x128xbf16>
    %cst_88 = arith.constant dense<0.000000e+00> : vector<32x128xf32>
    %221 = tpu.matmul %198, %220, %cst_88 {dimension_numbers = #tpu.dot_dimension_numbers<[1], [0], [0], [1], [0, 0, 1, 1], [], []>} : vector<32x224xbf16>, vector<224x128xbf16>, vector<32x128xf32> -> vector<32x128xf32>
    %222 = vector.broadcast %200 : vector<32x1xf32> to vector<32x128xf32>
    %223 = arith.addf %221, %222 : vector<32x128xf32>
    %cst_89 = arith.constant 0.000000e+00 : f32
    %224 = vector.broadcast %cst_89 : f32 to vector<32x128xf32>
    %225 = arith.cmpf ogt, %223, %224 : vector<32x128xf32>
    %cst_90 = arith.constant 0.00999999977 : f32
    %226 = vector.broadcast %cst_90 : f32 to vector<32x128xf32>
    %227 = arith.mulf %226, %223 : vector<32x128xf32>
    %228 = arith.select %225, %223, %227 : vector<32x128xi1>, vector<32x128xf32>
    %c3 = arith.constant 3 : index
    %c0_91 = arith.constant 0 : index
    %c0_92 = arith.constant 0 : index
    %229 = vector.load %arg8[%c3, %c0_91, %c0_92] : memref<5x32x224xbf16, #tpu.memory_space<vmem>>, vector<1x32x224xbf16>
    %230 = vector.shape_cast %229 : vector<1x32x224xbf16> to vector<32x224xbf16>
    %c3_93 = arith.constant 3 : index
    %c0_94 = arith.constant 0 : index
    %c0_95 = arith.constant 0 : index
    %231 = vector.load %arg9[%c3_93, %c0_94, %c0_95] : memref<5x32x1xf32, #tpu.memory_space<vmem>>, vector<1x32x1xf32>
    %232 = vector.shape_cast %231 : vector<1x32x1xf32> to vector<32x1xf32>
    %cst_96 = arith.constant 0.000000e+00 : f32
    %233 = vector.broadcast %cst_96 : f32 to vector<32x3xf32>
    %234 = vector.extract_strided_slice %228 {offsets = [0, 0], sizes = [32, 125], strides = [1, 1]} : vector<32x128xf32> to vector<32x125xf32>
    %235 = tpu.concatenate %233, %234 in 1 : vector<32x3xf32>, vector<32x125xf32> -> vector<32x128xf32>
    %cst_97 = arith.constant 0.000000e+00 : f32
    %236 = vector.broadcast %cst_97 : f32 to vector<32x2xf32>
    %237 = vector.extract_strided_slice %228 {offsets = [0, 0], sizes = [32, 126], strides = [1, 1]} : vector<32x128xf32> to vector<32x126xf32>
    %238 = tpu.concatenate %236, %237 in 1 : vector<32x2xf32>, vector<32x126xf32> -> vector<32x128xf32>
    %cst_98 = arith.constant 0.000000e+00 : f32
    %239 = vector.broadcast %cst_98 : f32 to vector<32x1xf32>
    %240 = vector.extract_strided_slice %228 {offsets = [0, 0], sizes = [32, 127], strides = [1, 1]} : vector<32x128xf32> to vector<32x127xf32>
    %241 = tpu.concatenate %239, %240 in 1 : vector<32x1xf32>, vector<32x127xf32> -> vector<32x128xf32>
    %cst_99 = arith.constant 0.000000e+00 : f32
    %242 = vector.broadcast %cst_99 : f32 to vector<32x1xf32>
    %243 = vector.extract_strided_slice %228 {offsets = [0, 1], sizes = [32, 127], strides = [1, 1]} : vector<32x128xf32> to vector<32x127xf32>
    %244 = tpu.concatenate %243, %242 in 1 : vector<32x127xf32>, vector<32x1xf32> -> vector<32x128xf32>
    %cst_100 = arith.constant 0.000000e+00 : f32
    %245 = vector.broadcast %cst_100 : f32 to vector<32x2xf32>
    %246 = vector.extract_strided_slice %228 {offsets = [0, 2], sizes = [32, 126], strides = [1, 1]} : vector<32x128xf32> to vector<32x126xf32>
    %247 = tpu.concatenate %246, %245 in 1 : vector<32x126xf32>, vector<32x2xf32> -> vector<32x128xf32>
    %cst_101 = arith.constant 0.000000e+00 : f32
    %248 = vector.broadcast %cst_101 : f32 to vector<32x3xf32>
    %249 = vector.extract_strided_slice %228 {offsets = [0, 3], sizes = [32, 125], strides = [1, 1]} : vector<32x128xf32> to vector<32x125xf32>
    %250 = tpu.concatenate %249, %248 in 1 : vector<32x125xf32>, vector<32x3xf32> -> vector<32x128xf32>
    %251 = tpu.concatenate %235, %238, %241, %228, %244, %247, %250 in 0 : vector<32x128xf32>, vector<32x128xf32>, vector<32x128xf32>, vector<32x128xf32>, vector<32x128xf32>, vector<32x128xf32>, vector<32x128xf32> -> vector<224x128xf32>
    %252 = arith.truncf %251 : vector<224x128xf32> to vector<224x128xbf16>
    %cst_102 = arith.constant dense<0.000000e+00> : vector<32x128xf32>
    %253 = tpu.matmul %230, %252, %cst_102 {dimension_numbers = #tpu.dot_dimension_numbers<[1], [0], [0], [1], [0, 0, 1, 1], [], []>} : vector<32x224xbf16>, vector<224x128xbf16>, vector<32x128xf32> -> vector<32x128xf32>
    %254 = vector.broadcast %232 : vector<32x1xf32> to vector<32x128xf32>
    %255 = arith.addf %253, %254 : vector<32x128xf32>
    %256 = arith.addf %196, %255 : vector<32x128xf32>
    %c4 = arith.constant 4 : index
    %c0_103 = arith.constant 0 : index
    %c0_104 = arith.constant 0 : index
    %257 = vector.load %arg8[%c4, %c0_103, %c0_104] : memref<5x32x224xbf16, #tpu.memory_space<vmem>>, vector<1x32x224xbf16>
    %258 = vector.shape_cast %257 : vector<1x32x224xbf16> to vector<32x224xbf16>
    %c4_105 = arith.constant 4 : index
    %c0_106 = arith.constant 0 : index
    %c0_107 = arith.constant 0 : index
    %259 = vector.load %arg9[%c4_105, %c0_106, %c0_107] : memref<5x32x1xf32, #tpu.memory_space<vmem>>, vector<1x32x1xf32>
    %260 = vector.shape_cast %259 : vector<1x32x1xf32> to vector<32x1xf32>
    %cst_108 = arith.constant 0.000000e+00 : f32
    %261 = vector.broadcast %cst_108 : f32 to vector<32x3xf32>
    %262 = vector.extract_strided_slice %256 {offsets = [0, 0], sizes = [32, 125], strides = [1, 1]} : vector<32x128xf32> to vector<32x125xf32>
    %263 = tpu.concatenate %261, %262 in 1 : vector<32x3xf32>, vector<32x125xf32> -> vector<32x128xf32>
    %cst_109 = arith.constant 0.000000e+00 : f32
    %264 = vector.broadcast %cst_109 : f32 to vector<32x2xf32>
    %265 = vector.extract_strided_slice %256 {offsets = [0, 0], sizes = [32, 126], strides = [1, 1]} : vector<32x128xf32> to vector<32x126xf32>
    %266 = tpu.concatenate %264, %265 in 1 : vector<32x2xf32>, vector<32x126xf32> -> vector<32x128xf32>
    %cst_110 = arith.constant 0.000000e+00 : f32
    %267 = vector.broadcast %cst_110 : f32 to vector<32x1xf32>
    %268 = vector.extract_strided_slice %256 {offsets = [0, 0], sizes = [32, 127], strides = [1, 1]} : vector<32x128xf32> to vector<32x127xf32>
    %269 = tpu.concatenate %267, %268 in 1 : vector<32x1xf32>, vector<32x127xf32> -> vector<32x128xf32>
    %cst_111 = arith.constant 0.000000e+00 : f32
    %270 = vector.broadcast %cst_111 : f32 to vector<32x1xf32>
    %271 = vector.extract_strided_slice %256 {offsets = [0, 1], sizes = [32, 127], strides = [1, 1]} : vector<32x128xf32> to vector<32x127xf32>
    %272 = tpu.concatenate %271, %270 in 1 : vector<32x127xf32>, vector<32x1xf32> -> vector<32x128xf32>
    %cst_112 = arith.constant 0.000000e+00 : f32
    %273 = vector.broadcast %cst_112 : f32 to vector<32x2xf32>
    %274 = vector.extract_strided_slice %256 {offsets = [0, 2], sizes = [32, 126], strides = [1, 1]} : vector<32x128xf32> to vector<32x126xf32>
    %275 = tpu.concatenate %274, %273 in 1 : vector<32x126xf32>, vector<32x2xf32> -> vector<32x128xf32>
    %cst_113 = arith.constant 0.000000e+00 : f32
    %276 = vector.broadcast %cst_113 : f32 to vector<32x3xf32>
    %277 = vector.extract_strided_slice %256 {offsets = [0, 3], sizes = [32, 125], strides = [1, 1]} : vector<32x128xf32> to vector<32x125xf32>
    %278 = tpu.concatenate %277, %276 in 1 : vector<32x125xf32>, vector<32x3xf32> -> vector<32x128xf32>
    %279 = tpu.concatenate %263, %266, %269, %256, %272, %275, %278 in 0 : vector<32x128xf32>, vector<32x128xf32>, vector<32x128xf32>, vector<32x128xf32>, vector<32x128xf32>, vector<32x128xf32>, vector<32x128xf32> -> vector<224x128xf32>
    %280 = arith.truncf %279 : vector<224x128xf32> to vector<224x128xbf16>
    %cst_114 = arith.constant dense<0.000000e+00> : vector<32x128xf32>
    %281 = tpu.matmul %258, %280, %cst_114 {dimension_numbers = #tpu.dot_dimension_numbers<[1], [0], [0], [1], [0, 0, 1, 1], [], []>} : vector<32x224xbf16>, vector<224x128xbf16>, vector<32x128xf32> -> vector<32x128xf32>
    %282 = vector.broadcast %260 : vector<32x1xf32> to vector<32x128xf32>
    %283 = arith.addf %281, %282 : vector<32x128xf32>
    %284 = arith.addf %136, %283 : vector<32x128xf32>
    %c0_115 = arith.constant 0 : index
    %c0_116 = arith.constant 0 : index
    %285 = vector.load %arg10[%c0_115, %c0_116] : memref<4x96xbf16, #tpu.memory_space<vmem>>, vector<4x96xbf16>
    %c0_117 = arith.constant 0 : index
    %c0_118 = arith.constant 0 : index
    %286 = vector.load %arg11[%c0_117, %c0_118] : memref<4x1xf32, #tpu.memory_space<vmem>>, vector<4x1xf32>
    %cst_119 = arith.constant 0.000000e+00 : f32
    %287 = vector.broadcast %cst_119 : f32 to vector<32x1xf32>
    %288 = vector.extract_strided_slice %284 {offsets = [0, 0], sizes = [32, 127], strides = [1, 1]} : vector<32x128xf32> to vector<32x127xf32>
    %289 = tpu.concatenate %287, %288 in 1 : vector<32x1xf32>, vector<32x127xf32> -> vector<32x128xf32>
    %cst_120 = arith.constant 0.000000e+00 : f32
    %290 = vector.broadcast %cst_120 : f32 to vector<32x1xf32>
    %291 = vector.extract_strided_slice %284 {offsets = [0, 1], sizes = [32, 127], strides = [1, 1]} : vector<32x128xf32> to vector<32x127xf32>
    %292 = tpu.concatenate %291, %290 in 1 : vector<32x127xf32>, vector<32x1xf32> -> vector<32x128xf32>
    %293 = tpu.concatenate %289, %284, %292 in 0 : vector<32x128xf32>, vector<32x128xf32>, vector<32x128xf32> -> vector<96x128xf32>
    %294 = arith.truncf %293 : vector<96x128xf32> to vector<96x128xbf16>
    %cst_121 = arith.constant dense<0.000000e+00> : vector<4x128xf32>
    %295 = tpu.matmul %285, %294, %cst_121 {dimension_numbers = #tpu.dot_dimension_numbers<[1], [0], [0], [1], [0, 0, 1, 1], [], []>} : vector<4x96xbf16>, vector<96x128xbf16>, vector<4x128xf32> -> vector<4x128xf32>
    %296 = vector.broadcast %286 : vector<4x1xf32> to vector<4x128xf32>
    %297 = arith.addf %295, %296 : vector<4x128xf32>
    %c0_122 = arith.constant 0 : index
    %c0_123 = arith.constant 0 : index
    %c0_124 = arith.constant 0 : index
    %298 = vector.load %arg12[%c0_122, %c0_123, %c0_124] : memref<1x4x128xf32, #tpu.memory_space<vmem>>, vector<1x4x128xf32>
    %299 = vector.shape_cast %298 : vector<1x4x128xf32> to vector<4x128xf32>
    %300 = vector.shape_cast %297 : vector<4x128xf32> to vector<1x4x128xf32>
    tpu.vector_store %arg12[%c0_122, %c0_123, %c0_124], %300 {strides = array<i32>} : memref<1x4x128xf32, #tpu.memory_space<vmem>>, vector<1x4x128xf32>,
    return
  }
  func.func @transform_0(%arg0: i32) -> (i32, i32, i32) {
    %c0_i32 = arith.constant 0 : i32
    %c0_i32_0 = arith.constant 0 : i32
    %c0_i32_1 = arith.constant 0 : i32
    return %arg0, %c0_i32, %c0_i32_0 : i32, i32, i32
  }
  func.func @transform_1(%arg0: i32) -> (i32, i32) {
    %c0_i32 = arith.constant 0 : i32
    %c0_i32_0 = arith.constant 0 : i32
    %c0_i32_1 = arith.constant 0 : i32
    return %c0_i32, %c0_i32_0 : i32, i32
  }
  func.func @transform_2(%arg0: i32) -> (i32, i32) {
    %c0_i32 = arith.constant 0 : i32
    %c0_i32_0 = arith.constant 0 : i32
    %c0_i32_1 = arith.constant 0 : i32
    return %c0_i32, %c0_i32_0 : i32, i32
  }
  func.func @transform_3(%arg0: i32) -> (i32, i32) {
    %c0_i32 = arith.constant 0 : i32
    %c0_i32_0 = arith.constant 0 : i32
    %c0_i32_1 = arith.constant 0 : i32
    return %c0_i32, %c0_i32_0 : i32, i32
  }
  func.func @transform_4(%arg0: i32) -> (i32, i32) {
    %c0_i32 = arith.constant 0 : i32
    %c0_i32_0 = arith.constant 0 : i32
    %c0_i32_1 = arith.constant 0 : i32
    return %c0_i32, %c0_i32_0 : i32, i32
  }
  func.func @transform_5(%arg0: i32) -> (i32, i32) {
    %c0_i32 = arith.constant 0 : i32
    %c0_i32_0 = arith.constant 0 : i32
    %c0_i32_1 = arith.constant 0 : i32
    return %c0_i32, %c0_i32_0 : i32, i32
  }
  func.func @transform_6(%arg0: i32) -> (i32, i32) {
    %c0_i32 = arith.constant 0 : i32
    %c0_i32_0 = arith.constant 0 : i32
    %c0_i32_1 = arith.constant 0 : i32
    return %c0_i32, %c0_i32_0 : i32, i32
  }
  func.func @transform_7(%arg0: i32) -> (i32, i32, i32) {
    %c0_i32 = arith.constant 0 : i32
    %c0_i32_0 = arith.constant 0 : i32
    %c0_i32_1 = arith.constant 0 : i32
    %c0_i32_2 = arith.constant 0 : i32
    return %c0_i32, %c0_i32_0, %c0_i32_1 : i32, i32, i32
  }
  func.func @transform_8(%arg0: i32) -> (i32, i32, i32) {
    %c0_i32 = arith.constant 0 : i32
    %c0_i32_0 = arith.constant 0 : i32
    %c0_i32_1 = arith.constant 0 : i32
    %c0_i32_2 = arith.constant 0 : i32
    return %c0_i32, %c0_i32_0, %c0_i32_1 : i32, i32, i32
  }
  func.func @transform_9(%arg0: i32) -> (i32, i32) {
    %c0_i32 = arith.constant 0 : i32
    %c0_i32_0 = arith.constant 0 : i32
    %c0_i32_1 = arith.constant 0 : i32
    return %c0_i32, %c0_i32_0 : i32, i32
  }
  func.func @transform_10(%arg0: i32) -> (i32, i32) {
    %c0_i32 = arith.constant 0 : i32
    %c0_i32_0 = arith.constant 0 : i32
    %c0_i32_1 = arith.constant 0 : i32
    return %c0_i32, %c0_i32_0 : i32, i32
  }
  func.func @transform_11(%arg0: i32) -> (i32, i32, i32) {
    %c0_i32 = arith.constant 0 : i32
    %c0_i32_0 = arith.constant 0 : i32
    %c0_i32_1 = arith.constant 0 : i32
    return %arg0, %c0_i32, %c0_i32_0 : i32, i32, i32
  }
}

</mosaic_0001>

<bundles_post_ra>
// kernel: stofnet_forward.1
= control target key start
LH: loop header
LB: loop body
LE: loop exit
PB: predicated region body
PF: predicated region fallthrough
CT: control target
= control target key end

     0   :  { %s3435_s17 = smov 0   ;;  %s4163_s0 = inlined_call_operand.vmem [shape: f32[2,1,128], index: 0, kind: input, shape index: {}]   ;;  %s4164_s1 = inlined_call_operand.vmem [shape: bf16[32,9], index: 1, kind: input, shape index: {}]   ;;  %s4165_s2 = inlined_call_operand.vmem [shape: f32[32,1], index: 2, kind: input, shape index: {}]   ;;  %s4166_s3 = inlined_call_operand.vmem [shape: bf16[32,160], index: 3, kind: input, shape index: {}]   ;;  %s4167_s4 = inlined_call_operand.vmem [shape: f32[32,1], index: 4, kind: input, shape index: {}]   ;;  %s4168_s5 = inlined_call_operand.vmem [shape: bf16[32,160], index: 5, kind: input, shape index: {}]   ;;  %s4169_s6 = inlined_call_operand.vmem [shape: f32[32,1], index: 6, kind: input, shape index: {}]   ;;  %s4170_s7 = inlined_call_operand.vmem [shape: bf16[5,32,224], index: 7, kind: input, shape index: {}]   ;;  %s4171_s8 = inlined_call_operand.vmem [shape: f32[5,32,1], index: 8, kind: input, shape index: {}]   ;;  %s4172_s9 = inlined_call_operand.vmem [shape: bf16[4,96], index: 9, kind: input, shape index: {}]   ;;  %s4173_s10 = inlined_call_operand.vmem [shape: f32[4,1], index: 10, kind: input, shape index: {}]   ;;  %s4174_s11 = inlined_call_operand.vmem [shape: f32[2,4,128], index: 11, kind: output, shape index: {}]  }
   0x1 LB: > { %s2381_s18 = sadd.s32 4294967295, %s3357_s17   ;;  %p2385_p0 = scmp.ge.s32.totalorder %s3357_s17, 1  ;;  %s3357_s17 = sphi %s3435_s17, %s21_s17  }
   0x2   : > { %p335_p1 = scmp.lt.s32.totalorder %s3357_s17, 3 }
   0x4   : > { %p336_p2 = pnand %p2385_p0, %p335_p1 }
   0x5   : > { %p372_p3 = scmp.lt.s32.totalorder (!%p336_p2), %s2381_s18, 1  ;;  %s3359_s22 = smov (!%p336_p2), 3  }
   0x6   : > { %339 = sbr.rel (%p336_p2) target bundleno = 4055 (0xfd7), region = 64  ;;  %s3360_s23 = smov (!%p336_p2), 4  }
   0x7   : > { %s3361_s24 = smov (!%p336_p2), 2   ;;  %s3362_s25 = smov (!%p336_p2), 1  }
   0x8   : > { %s3363_s26 = smov (!%p336_p2), 127   ;;  %s3364_s27 = smov (!%p336_p2), 126  }
   0x9   : > { %s3365_s30 = smov (!%p336_p2), 125   ;;  %s3366_s12 = smov (!%p336_p2), 124  }
   0xa   : > { %s3371_s29 = smov (!%p336_p2), 16   ;;  %s3372_s13 = smov (!%p336_p2), 112  }
   0xb   : > { %s4196_s18 = smov (!%p372_p3, %s2381_s18), 1  ;;  %v3307_v1 = vld [vmem:[%s4164_s1] sm:$0xff]   ;;  %vm498_vm0 = vcmask 72704   ;;  %v3367_v2 = vmov 0   ;;  %v388_v3 = vld [vmem:[%s4165_s2 + $0x18] sm:$0xff]  ;;  %v387_v4 = vld [vmem:[%s4165_s2 + $0x10] sm:$0xff] }
   0xc   : > { %s374_s21 = scalar_lea.vmem %s4163_s0, %s4196_s18  ;;  %2801 = vmatprep.mubr.msk.bf16.mxu0 %vm498_vm0, %v3307_v1  ;;  %2846 = vset.pattern.permute.xlu1 %v3367_v2  ;;  %v385_v5 = vld [vmem:[%s4165_s2] sm:$0xff]  ;;  %v386_v6 = vld [vmem:[%s4165_s2 + $0x8] sm:$0xff]  ;;  %vm402_vm1 = vcmask 23552   ;;  %vm397_vm2 = vcmask 31744   ;;  %vm407_vm3 = vcmask 15360   ;;  %vm412_vm4 = vcmask 7168  }
   0xd   : > { %v3449_v0 = vld [vmem:[%s374_s21] ss:$0 sm:$0xff]  ;;  %2845 = vset.pattern.permute.xlu0 %v3367_v2  ;;  %702 = vmatprep.subr.bf16.mxu1 %v3367_v2  ;;  %vm453_vm5 = vcmask 1040384   ;;  %vm455_vm6 = vcmask 1041408   ;;  %vm457_vm7 = vcmask 1042432   ;;  %vm417_vm8 = vcmask 1039360  }
   0xe   : > { %399 = vrot.lane.b32.xlu0 %v3449_v0, %s3359_s22  ;;  %394 = vrot.lane.b32.xlu1 %v3449_v0, %s3360_s23  ;;  %vm422_vm9 = vcmask 1031168   ;;  %vm459_vm10 = vcmask 1043456   ;;  %vm461_vm11 = vcmask 1044480   ;;  %vm4175_vm12 = vcmask 1022976   ;;  %v3308_v41 = vld [vmem:[%s4164_s1 + $0x8] sm:$0xff]   ;;  %v569_v60 = vld [vmem:[%s4167_s4 + $0x10] sm:$0xff] }
   0xf   : > { %vm432_vm13 = vcmask 1014784   ;;  %vm463_vm14 = vcmask 1045504   ;;  %vm465_vm15 = vcmask 1046528   ;;  %v3368_v32 = vmov 65535   ;;  %v570_v61 = vld [vmem:[%s4167_s4 + $0x18] sm:$0xff]  ;;  %v567_v62 = vld [vmem:[%s4167_s4] sm:$0xff] }
  0x10   : > { %v505_v33 = vsel %vm459_vm10, 4294967295, %v3368_v32  ;;  %v568_v63 = vld [vmem:[%s4167_s4 + $0x8] sm:$0xff]  ;;  %s2386_s21 = sshll.u32 %s4196_s18, 2 }
  0x11   : > { %v506_v38 = vsel %vm461_vm11, %v505_v33, 0 }
  0x12   : > { %404 = vrot.lane.b32.xlu0 %v3449_v0, %s3361_s24  ;;  %409 = vrot.lane.b32.xlu1 %v3449_v0, %s3362_s25 }
  0x16   : > { %414 = vrot.lane.b32.xlu0 %v3449_v0, %s3363_s26  ;;  %419 = vrot.lane.b32.xlu1 %v3449_v0, %s3364_s27 }
  0x1a   : > { %424 = vrot.lane.b32.xlu0 %v3449_v0, %s3365_s30  ;;  %429 = vrot.lane.b32.xlu1 %v3449_v0, %s3366_s12 }
  0x1e   : > { %485 = vperm.xlu1 %2846, %v388_v3   ;;  %480 = vperm.xlu0 %2845, %v387_v4  }
  0x22   : > { %470 = vperm.xlu1 %2846, %v385_v5   ;;  %475 = vperm.xlu0 %2845, %v386_v6   ;;  %v2238_v5 = vld [vmem:[%s4172_s9] sm:$0x3] }
  0x80   : > { %v400_v7 = vpop.permute.xlu0 %399  ;;  %v395_v8 = vpop.permute.xlu1 %394 }
  0x81   : > { %v403_v9 = vsel %vm402_vm1, 0.0, %v400_v7  ;;  %v398_v11 = vsel %vm397_vm2, 0.0, %v395_v8 }
  0x82   : > { %v435_v10 = vrot.slane %v403_v9, 7 }
  0x84   : > { %v405_v12 = vpop.permute.xlu0 %404  ;;  %v410_v13 = vpop.permute.xlu1 %409  ;;  %v454_v18 = vsel %vm453_vm5, %v398_v11, %v435_v10  ;;  %vm3542_vm5 = vmpackc.low %vm417_vm8, %vm417_vm8 }
  0x85   : > { %v408_v14 = vsel %vm407_vm3, 0.0, %v405_v12  ;;  %v413_v15 = vsel %vm412_vm4, 0.0, %v410_v13 }
  0x86   : > { %v438_v16 = vrot.slane %v408_v14, 6  ;;  %v441_v17 = vrot.slane %v413_v15, 5 }
  0x88   : > { %v456_v19 = vsel %vm455_vm6, %v454_v18, %v438_v16  ;;  %v415_v20 = vpop.permute.xlu0 %414  ;;  %v420_v21 = vpop.permute.xlu1 %419  ;;  %vm2402_vm6 = vmneg %vm412_vm4 }
  0x89   : > { %v458_v22 = vsel %vm457_vm7, %v456_v19, %v441_v17  ;;  %v418_v23 = vsel %vm417_vm8, %v415_v20, 0.0  ;;  %v423_v24 = vsel %vm422_vm9, %v420_v21, 0.0  ;;  %vm3558_vm7 = vmpackc.low %vm2402_vm6, %vm2402_vm6 }
  0x8a   : > { %v445_v25 = vrot.slane %v418_v23, 3  ;;  %v460_v26 = vsel %vm459_vm10, %v458_v22, %v3449_v0  ;;  %v448_v27 = vrot.slane %v423_v24, 2  ;;  %v3311_v0 = vld [vmem:[%s4166_s3 + $0x4] ss:$8 sps:$4 sm:$0xff]   ;;  %vm2412_vm10 = vmneg %vm407_vm3 }
  0x8c   : > { %v425_v28 = vpop.permute.xlu0 %424  ;;  %v430_v29 = vpop.permute.xlu1 %429  ;;  %v462_v30 = vsel %vm461_vm11, %v460_v26, %v445_v25  ;;  %vm3569_vm11 = vmpackc.low %vm2412_vm10, %vm2412_vm10 }
  0x8d   : > { %v428_v31 = vsel %vm4175_vm12, %v425_v28, 0.0  ;;  %v433_v35 = vsel %vm432_vm13, %v430_v29, 0.0  ;;  %v464_v36 = vsel %vm463_vm14, %v462_v30, %v448_v27  ;;  %vm3581_vm14 = vmpackc.low %vm422_vm9, %vm422_vm9 }
  0x8e   : > { %v451_v34 = vrot.slane %v428_v31, 1 }
  0x90   : > { %v466_v37 = vsel %vm465_vm15, %v464_v36, %v451_v34 }
  0x91   : > { %v467_v39 = vpack.c.bf16 %v433_v35, %v466_v37  ;;  %v3348_v35 = vld [vmem:[%s4170_s7 + $0x94] ss:$8 sps:$4 sm:$0xff]  }
  0x93   : > { %v508_v40 = vand.u32 %v506_v38, %v467_v39 }
  0x95   : > { %2799 = vmatprep.subr.bf16.mxu0 %v508_v40 }
  0x96   : > { %2800 = vmatpush3.bf16.msra.mxu0 %v508_v40  ;;  %v3309_v40 = vld [vmem:[%s4166_s3] ss:$8 sps:$4 sm:$0xff]  }
  0x97   : > { %1053 = vmatprep.subr.bf16.mxu0 %v3367_v2 }
  0x99   : > { %2802 = vmatmul.mubr.msk.bf16.vlgmr.msra.gmra.mxu0 %vm498_vm0, %v3308_v41  ;;  %v486_v42 = vpop.permute.xlu1 %485  ;;  %v481_v44 = vpop.permute.xlu0 %480  ;;  %vm695_vm0 = vcmask 261120   ;;  %v3312_v41 = vld [vmem:[%s4166_s3 + $0x14] ss:$8 sps:$4 sm:$0xff]  }
  0x9a   : > { %2428 = vmatprep.mubr.msk.bf16.mxu1 %vm695_vm0, %v3311_v0 }
  0x9d   : > { %v471_v45 = vpop.permute.xlu1 %470  ;;  %v476_v51 = vpop.permute.xlu0 %475 }
 0x159   : > { %v2803_v43 = vpop.f32.mrf.mxu0 }
 0x15a   : > { %v553_v47 = vadd.f32 %v2803_v43, %v481_v44 }
 0x15b   : > { %v544_v46 = vpop.f32.mrf.mxu0 }
 0x15c   : > { %v545_v49 = vadd.f32 %v544_v46, %v471_v45  ;;  %v3504_v53 = vmax.f32 %v553_v47, 0.0 }
 0x15d   : > { %v2804_v48 = vpop.f32.mrf.mxu0 }
 0x15e   : > { %v556_v50 = vadd.f32 %v2804_v48, %v486_v42  ;;  %v3508_v56 = vmax.f32 %v545_v49, 0.0  ;;  %v3314_v42 = vld [vmem:[%s4166_s3 + $0x10] ss:$8 sps:$4 sm:$0xff]  }
 0x15f   : > { %v547_v52 = vpop.f32.mrf.mxu0 }
 0x160   : > { %v3506_v54 = vmax.f32 %v556_v50, 0.0  ;;  %v548_v55 = vadd.f32 %v547_v52, %v476_v51 }
 0x162   : > { %v3510_v57 = vmax.f32 %v548_v55, 0.0  ;;  %v2847_v58 = vpack.i.bf16 %v3506_v54, %v3504_v53  ;;  %v652_v11 = vpack.c.bf16 %v3506_v54, %v3504_v53 }
 0x164   : > { %2848 = vrot.lane.b32.xlu1 %v2847_v58, %s3363_s26  ;;  %v2852_v59 = vpack.i.bf16 %v3510_v57, %v3508_v56  ;;  %v651_v15 = vpack.c.bf16 %v3510_v57, %v3508_v56 }
 0x166   : > { %2853 = vrot.lane.b32.xlu0 %v2852_v59, %s3363_s26 }
 0x168   : > { %2858 = vrot.lane.b32.xlu1 %v2847_v58, %s3362_s25 }
 0x16a   : > { %2863 = vrot.lane.b32.xlu0 %v2852_v59, %s3362_s25 }
 0x16c   : > { %2868 = vrot.lane.b32.xlu1 %v2847_v58, %s3361_s24 }
 0x16e   : > { %2873 = vrot.lane.b32.xlu0 %v2852_v59, %s3361_s24 }
 0x170   : > { %2878 = vrot.lane.b32.xlu1 %v2847_v58, %s3364_s27 }
 0x172   : > { %2883 = vrot.lane.b32.xlu0 %v2852_v59, %s3364_s27 }
 0x174   : > { %669 = vperm.xlu1 %2846, %v569_v60  }
 0x176   : > { %674 = vperm.xlu0 %2845, %v570_v61  }
 0x178   : > { %659 = vperm.xlu1 %2846, %v567_v62  }
 0x17a   : > { %664 = vperm.xlu0 %2845, %v568_v63  }
 0x1d6   : > { %v2849_v1 = vpop.permute.xlu1 %2848 }
 0x1d7   : > { %v2851_v3 = vunpack.i.h.bf16 %v2849_v1  ;;  %v2850_v4 = vunpack.i.l.bf16 %v2849_v1 }
 0x1d8   : > { %v2854_v6 = vpop.permute.xlu0 %2853 }
 0x1d9   : > { %v2856_v7 = vunpack.i.h.bf16 %v2854_v6  ;;  %v2855_v8 = vunpack.i.l.bf16 %v2854_v6  ;;  %v2397_v9 = vpack.c.bf16 %v2851_v3, %v2850_v4 }
 0x1da   : > { %v2859_v12 = vpop.permute.xlu1 %2858 }
 0x1db   : > { %2398 = vmatpush1.bf16.msk.msra.mxu1 %vm3542_vm5, %v2397_v9  ;;  %v2400_v10 = vpack.c.bf16 %v2856_v7, %v2855_v8  ;;  %v2861_v13 = vunpack.i.h.bf16 %v2859_v12  ;;  %v2860_v14 = vunpack.i.l.bf16 %v2859_v12 }
 0x1dc   : > { %704 = vmatprep.subr.bf16.mxu1 %v3367_v2  ;;  %v2864_v16 = vpop.permute.xlu0 %2863 }
 0x1dd   : > { %v2405_v18 = vpack.c.bf16 %v2861_v13, %v2860_v14  ;;  %v2866_v19 = vunpack.i.h.bf16 %v2864_v16  ;;  %v2865_v20 = vunpack.i.l.bf16 %v2864_v16 }
 0x1de   : > { %v2869_v21 = vpop.permute.xlu1 %2868 }
 0x1df   : > { %2401 = vmatpush1.bf16.msk.msra.mxu1 %vm3542_vm5, %v2400_v10  ;;  %v2410_v22 = vpack.c.bf16 %v2866_v19, %v2865_v20  ;;  %v2871_v23 = vunpack.i.h.bf16 %v2869_v21  ;;  %v2870_v24 = vunpack.i.l.bf16 %v2869_v21 }
 0x1e0   : > { %706 = vmatprep.subr.bf16.mxu1 %v3367_v2  ;;  %v2874_v25 = vpop.permute.xlu0 %2873 }
 0x1e1   : > { %v2415_v27 = vpack.c.bf16 %v2871_v23, %v2870_v24  ;;  %v2876_v28 = vunpack.i.h.bf16 %v2874_v25  ;;  %v2875_v29 = vunpack.i.l.bf16 %v2874_v25 }
 0x1e2   : > { %v2879_v30 = vpop.permute.xlu1 %2878 }
 0x1e3   : > { %707 = vmatpush1.bf16.msra.mxu1 %v652_v11  ;;  %v2420_v31 = vpack.c.bf16 %v2876_v28, %v2875_v29  ;;  %v2881_v32 = vunpack.i.h.bf16 %v2879_v30  ;;  %v2880_v33 = vunpack.i.l.bf16 %v2879_v30 }
 0x1e4   : > { %708 = vmatprep.subr.bf16.mxu1 %v3367_v2  ;;  %v2884_v34 = vpop.permute.xlu0 %2883 }
 0x1e5   : > { %v2423_v36 = vpack.c.bf16 %v2881_v32, %v2880_v33  ;;  %v2886_v37 = vunpack.i.h.bf16 %v2884_v34  ;;  %v2885_v38 = vunpack.i.l.bf16 %v2884_v34 }
 0x1e7   : > { %709 = vmatpush1.bf16.msra.mxu1 %v651_v15  ;;  %v2426_v39 = vpack.c.bf16 %v2886_v37, %v2885_v38 }
 0x1e8   : > { %710 = vmatprep.subr.bf16.mxu1 %v3367_v2 }
 0x1eb   : > { %2406 = vmatpush1.bf16.msk.msra.mxu1 %vm3558_vm7, %v2405_v18 }
 0x1ec   : > { %712 = vmatprep.subr.bf16.mxu1 %v3367_v2 }
 0x1ef   : > { %2411 = vmatpush1.bf16.msk.msra.mxu1 %vm3558_vm7, %v2410_v22  ;;  %v670_v43 = vpop.permute.xlu1 %669 }
 0x1f0   : > { %714 = vmatprep.subr.bf16.mxu1 %v3367_v2 }
 0x1f1   : > { %v675_v44 = vpop.permute.xlu0 %674 }
 0x1f3   : > { %2416 = vmatpush1.bf16.msk.msra.mxu1 %vm3569_vm11, %v2415_v27  ;;  %v660_v45 = vpop.permute.xlu1 %659 }
 0x1f4   : > { %716 = vmatprep.subr.bf16.mxu1 %v3367_v2 }
 0x1f5   : > { %v665_v49 = vpop.permute.xlu0 %664 }
 0x1f7   : > { %2421 = vmatpush1.bf16.msk.msra.mxu1 %vm3569_vm11, %v2420_v31 }
 0x1f8   : > { %730 = vmatprep.subr.bf16.mxu1 %v3367_v2 }
 0x1fb   : > { %2424 = vmatpush2.bf16.msk.msra.mxu1 %vm3581_vm14, %v2423_v36 }
 0x1fc   : > { %732 = vmatprep.subr.bf16.mxu1 %v3367_v2 }
 0x1ff   : > { %2427 = vmatpush2.bf16.msk.msra.mxu1 %vm3581_vm14, %v2426_v39 }
 0x200   : > { %1285 = vmatprep.subr.bf16.mxu1 %v3367_v2 }
 0x202   : > { %735 = vmatmul.mubr.bf16.vlgmr.msra.gmra.mxu1 %v3309_v40 }
 0x203   : > { %2429 = vmatprep.mubr.msk.bf16.mxu1 %vm695_vm0, %v3312_v41 }
 0x20a   : > { %743 = vmatmul.mubr.bf16.gmra.mxu1 %v3314_v42 }
 0x2c2   : > { %v736_v46 = vpop.f32.mrf.mxu1 }
 0x2c3   : > { %v737_v47 = vadd.f32 %v736_v46, %v660_v45 }
 0x2c4   : > { %v738_v48 = vpop.f32.mrf.mxu1 }
 0x2c5   : > { %v755_v51 = vmul.f32 0.01, %v737_v47  ;;  %vm751_vm15 = vcmp.gt.f32.partialorder %v737_v47, 0.0 }
 0x2c6   : > { %v739_v50 = vpop.f32.mrf.mxu1 }
 0x2c7   : > { %v740_v52 = vadd.f32 %v739_v50, %v665_v49  ;;  %v759_v61 = vsel %vm751_vm15, %v737_v47, %v755_v51 }
 0x2c8   : > { %v741_v55 = vpop.f32.mrf.mxu1 }
 0x2c9   : > { %vm752_vm6 = vcmp.gt.f32.partialorder %v740_v52, 0.0  ;;  %v756_v58 = vmul.f32 0.01, %v740_v52 }
 0x2ca   : > { %v744_v59 = vpop.f32.mrf.mxu1 }
 0x2cb   : > { %v745_v60 = vadd.f32 %v744_v59, %v670_v43  ;;  %v760_v62 = vsel %vm752_vm6, %v740_v52, %v756_v58  ;;  %vm943_vm6 = vcmask 130048  }
 0x2cc   : > { %v746_v63 = vpop.f32.mrf.mxu1  ;;  %v2892_v0 = vpack.i.bf16 %v760_v62, %v759_v61 }
 0x2cd   : > { %v757_v3 = vmul.f32 0.01, %v745_v60  ;;  %vm753_vm10 = vcmp.gt.f32.partialorder %v745_v60, 0.0 }
 0x2ce   : > { %v747_v1 = vpop.f32.mrf.mxu1  ;;  %2893 = vrot.lane.b32.xlu0 %v2892_v0, %s3363_s26 }
 0x2cf   : > { %v748_v4 = vadd.f32 %v747_v1, %v675_v44  ;;  %v761_v8 = vsel %vm753_vm10, %v745_v60, %v757_v3  ;;  %v835_v3 = vlaneseq  ;;  %vm3678_vm10 = vmneg %vm943_vm6 }
 0x2d0   : > { %v749_v6 = vpop.f32.mrf.mxu1 }
 0x2d1   : > { %vm754_vm12 = vcmp.gt.f32.partialorder %v748_v4, 0.0  ;;  %v758_v7 = vmul.f32 0.01, %v748_v4 }
 0x2d3   : > { %v762_v9 = vsel %vm754_vm12, %v748_v4, %v758_v7  ;;  %v836_v4 = vand.u32 127, %v835_v3  ;;  %vm960_vm12 = vcmask 64512  }
 0x2d4   : > { %v2887_v10 = vpack.i.bf16 %v762_v9, %v761_v8 }
 0x2d5   : > { %v841_v6 = vand.u32 7, %v836_v4 }
 0x2d6   : > { %2888 = vrot.lane.b32.xlu1 %v2887_v10, %s3363_s26 }
 0x2d7   : > { %v849_v7 = vand.u32 1, %v841_v6 }
 0x340   : > { %v2894_v11 = vpop.permute.xlu0 %2893 }
 0x341   : > { %v2896_v12 = vunpack.i.h.bf16 %v2894_v11  ;;  %v2895_v13 = vunpack.i.l.bf16 %v2894_v11 }
 0x343   : > { %v780_v14 = vsel %vm417_vm8, %v2896_v12, 0.0  ;;  %v779_v15 = vsel %vm417_vm8, %v2895_v13, 0.0 }
 0x344   : > { %v783_v16 = vmax.f32 %v759_v61, %v779_v15  ;;  %v784_v18 = vmax.f32 %v760_v62, %v780_v14 }
 0x346   : > { %v2902_v19 = vpack.i.bf16 %v784_v18, %v783_v16 }
 0x348   : > { %v2889_v20 = vpop.permute.xlu1 %2888  ;;  %2903 = vrot.lane.b32.xlu0 %v2902_v19, %s3364_s27 }
 0x349   : > { %v2891_v21 = vunpack.i.h.bf16 %v2889_v20  ;;  %v2890_v22 = vunpack.i.l.bf16 %v2889_v20 }
 0x34b   : > { %v782_v23 = vsel %vm417_vm8, %v2891_v21, 0.0  ;;  %v781_v24 = vsel %vm417_vm8, %v2890_v22, 0.0  ;;  %vm850_vm8 = vcmp.ne.s32.totalorder %v849_v7, 0  ;;  %v576_v7 = vld [vmem:[%s4169_s6 + $0x8] sm:$0xff] }
 0x34c   : > { %v785_v25 = vmax.f32 %v761_v8, %v781_v24  ;;  %v786_v27 = vmax.f32 %v762_v9, %v782_v23 }
 0x34e   : > { %v2897_v28 = vpack.i.bf16 %v786_v27, %v785_v25 }
 0x350   : > { %2898 = vrot.lane.b32.xlu1 %v2897_v28, %s3364_s27 }
 0x3ba   : > { %v2904_v29 = vpop.permute.xlu0 %2903 }
 0x3bb   : > { %v2906_v30 = vunpack.i.h.bf16 %v2904_v29  ;;  %v2905_v31 = vunpack.i.l.bf16 %v2904_v29 }
 0x3bd   : > { %v804_v32 = vsel %vm422_vm9, %v2906_v30, 0.0  ;;  %v803_v33 = vsel %vm422_vm9, %v2905_v31, 0.0 }
 0x3be   : > { %v807_v34 = vmax.f32 %v783_v16, %v803_v33  ;;  %v808_v36 = vmax.f32 %v784_v18, %v804_v32 }
 0x3c0   : > { %v2912_v37 = vpack.i.bf16 %v808_v36, %v807_v34 }
 0x3c2   : > { %v2899_v38 = vpop.permute.xlu1 %2898  ;;  %2913 = vrot.lane.b32.xlu0 %v2912_v37, %s3366_s12 }
 0x3c3   : > { %v2901_v39 = vunpack.i.h.bf16 %v2899_v38  ;;  %v2900_v40 = vunpack.i.l.bf16 %v2899_v38 }
 0x3c5   : > { %v806_v41 = vsel %vm422_vm9, %v2901_v39, 0.0  ;;  %v805_v42 = vsel %vm422_vm9, %v2900_v40, 0.0 }
 0x3c6   : > { %v809_v43 = vmax.f32 %v785_v25, %v805_v42  ;;  %v810_v44 = vmax.f32 %v786_v27, %v806_v41  ;;  %v875_v25 = vand.u32 2, %v841_v6 }
 0x3c8   : > { %v2907_v45 = vpack.i.bf16 %v810_v44, %v809_v43  ;;  %vm876_vm9 = vcmp.ne.s32.totalorder %v875_v25, 0 }
 0x3ca   : > { %2908 = vrot.lane.b32.xlu1 %v2907_v45, %s3366_s12  ;;  %s3370_s12 = smov 8  }
 0x434   : > { %v2914_v46 = vpop.permute.xlu0 %2913 }
 0x435   : > { %v2916_v47 = vunpack.i.h.bf16 %v2914_v46  ;;  %v2915_v48 = vunpack.i.l.bf16 %v2914_v46 }
 0x437   : > { %v828_v49 = vsel %vm432_vm13, %v2916_v47, 0.0  ;;  %v827_v50 = vsel %vm432_vm13, %v2915_v48, 0.0 }
 0x438   : > { %v831_v51 = vmax.f32 %v807_v34, %v827_v50  ;;  %v832_v52 = vmax.f32 %v808_v36, %v828_v49 }
 0x43a   : > { %v2922_v55 = vpack.i.bf16 %v832_v52, %v831_v51 }
 0x43c   : > { %v2909_v58 = vpop.permute.xlu1 %2908  ;;  %2923 = vrot.lane.b32.xlu0 %v2922_v55, %s3362_s25 }
 0x43d   : > { %v2911_v59 = vunpack.i.h.bf16 %v2909_v58  ;;  %v2910_v60 = vunpack.i.l.bf16 %v2909_v58 }
 0x43f   : > { %v830_v61 = vsel %vm432_vm13, %v2911_v59, 0.0  ;;  %v829_v62 = vsel %vm432_vm13, %v2910_v60, 0.0  ;;  %vm3669_vm13 = vmneg %vm960_vm12 }
 0x440   : > { %v833_v63 = vmax.f32 %v809_v43, %v829_v62  ;;  %v834_v0 = vmax.f32 %v810_v44, %v830_v61  ;;  %v901_v44 = vand.u32 4, %v841_v6  ;;  %v578_v6 = vld [vmem:[%s4169_s6 + $0x18] sm:$0xff]  ;;  %vm2442_vm15 = vmpackc.low %vm3669_vm13, %vm3669_vm13  ;;  %vm1278_vm13 = vcmask 785408  }
 0x442   : > { %v2917_v1 = vpack.i.bf16 %v834_v0, %v833_v63 }
 0x444   : > { %2918 = vrot.lane.b32.xlu1 %v2917_v1, %s3362_s25 }
 0x4ae   : > { %v2924_v8 = vpop.permute.xlu0 %2923 }
 0x4af   : > { %v2926_v9 = vunpack.i.h.bf16 %v2924_v8  ;;  %v2925_v10 = vunpack.i.l.bf16 %v2924_v8  ;;  %v577_v8 = vld [vmem:[%s4169_s6 + $0x10] sm:$0xff] }
 0x4b1   : > { %v868_v11 = vsel %vm412_vm4, 0.0, %v2926_v9  ;;  %v867_v12 = vsel %vm412_vm4, 0.0, %v2925_v10  ;;  %v575_v9 = vld [vmem:[%s4169_s6] sm:$0xff] }
 0x4b2   : > { %v871_v13 = vsel %vm850_vm8, %v867_v12, %v831_v51  ;;  %v872_v14 = vsel %vm850_vm8, %v868_v11, %v832_v52  ;;  %v3315_v10 = vld [vmem:[%s4168_s5 + $0x4] ss:$8 sps:$4 sm:$0xff]  }
 0x4b3   : > { %v2932_v15 = vpack.i.bf16 %v872_v14, %v871_v13  ;;  %2466 = vmatprep.mubr.msk.bf16.mxu0 %vm695_vm0, %v3315_v10 }
 0x4b5   : > { %2933 = vrot.lane.b32.xlu0 %v2932_v15, %s3361_s24 }
 0x4b6   : > { %v2919_v16 = vpop.permute.xlu1 %2918 }
 0x4b7   : > { %v2921_v18 = vunpack.i.h.bf16 %v2919_v16  ;;  %v2920_v19 = vunpack.i.l.bf16 %v2919_v16 }
 0x4b9   : > { %v870_v20 = vsel %vm412_vm4, 0.0, %v2921_v18  ;;  %v869_v21 = vsel %vm412_vm4, 0.0, %v2920_v19  ;;  %vm3634_vm4 = vcmp.ne.s32.totalorder %v901_v44, 0 }
 0x4ba   : > { %v873_v22 = vsel %vm850_vm8, %v869_v21, %v833_v63  ;;  %v874_v23 = vsel %vm850_vm8, %v870_v20, %v834_v0  ;;  %vm2452_vm8 = vmpackc.low %vm3678_vm10, %vm3678_vm10 }
 0x4bb   : > { %v2927_v24 = vpack.i.bf16 %v874_v23, %v873_v22 }
 0x4bd   : > { %2928 = vrot.lane.b32.xlu1 %v2927_v24, %s3361_s24 }
 0x527   : > { %v2934_v27 = vpop.permute.xlu0 %2933 }
 0x528   : > { %v2936_v28 = vunpack.i.h.bf16 %v2934_v27  ;;  %v2935_v29 = vunpack.i.l.bf16 %v2934_v27 }
 0x52a   : > { %v894_v30 = vsel %vm407_vm3, 0.0, %v2936_v28  ;;  %v893_v31 = vsel %vm407_vm3, 0.0, %v2935_v29 }
 0x52b   : > { %v897_v32 = vsel %vm876_vm9, %v893_v31, %v871_v13  ;;  %v898_v33 = vsel %vm876_vm9, %v894_v30, %v872_v14 }
 0x52c   : > { %v2942_v34 = vpack.i.bf16 %v898_v33, %v897_v32 }
 0x52e   : > { %2943 = vrot.lane.b32.xlu0 %v2942_v34, %s3360_s23 }
 0x52f   : > { %v2929_v36 = vpop.permute.xlu1 %2928 }
 0x530   : > { %v2931_v37 = vunpack.i.h.bf16 %v2929_v36  ;;  %v2930_v38 = vunpack.i.l.bf16 %v2929_v36 }
 0x532   : > { %v896_v39 = vsel %vm407_vm3, 0.0, %v2931_v37  ;;  %v895_v40 = vsel %vm407_vm3, 0.0, %v2930_v38 }
 0x533   : > { %v899_v41 = vsel %vm876_vm9, %v895_v40, %v873_v22  ;;  %v900_v42 = vsel %vm876_vm9, %v896_v39, %v874_v23  ;;  %vm994_vm9 = vcmask 916480   ;;  %v1123_v23 = vld [vmem:[%s4171_s8 + $0x8] sm:$0xff] }
 0x534   : > { %v2937_v43 = vpack.i.bf16 %v900_v42, %v899_v41 }
 0x536   : > { %2938 = vrot.lane.b32.xlu1 %v2937_v43, %s3360_s23  ;;  %s3369_s23 = smov 120  }
 0x5a0   : > { %v2944_v45 = vpop.permute.xlu0 %2943 }
 0x5a1   : > { %v2946_v47 = vunpack.i.h.bf16 %v2944_v45  ;;  %v2945_v48 = vunpack.i.l.bf16 %v2944_v45 }
 0x5a3   : > { %v920_v49 = vsel %vm397_vm2, 0.0, %v2946_v47  ;;  %v919_v50 = vsel %vm397_vm2, 0.0, %v2945_v48  ;;  %v3317_v48 = vld [vmem:[%s4168_s5] ss:$8 sps:$4 sm:$0xff]  }
 0x5a4   : > { %v924_v51 = vsel %vm3634_vm4, %v920_v49, %v898_v33  ;;  %v923_v52 = vsel %vm3634_vm4, %v919_v50, %v897_v32  ;;  %v3318_v49 = vld [vmem:[%s4168_s5 + $0x14] ss:$8 sps:$4 sm:$0xff]   ;;  %v3320_v50 = vld [vmem:[%s4168_s5 + $0x10] ss:$8 sps:$4 sm:$0xff]  }
 0x5a5   : > { %v2952_v55 = vpack.i.bf16 %v924_v51, %v923_v52  ;;  %v1003_v58 = vpack.c.bf16 %v924_v51, %v923_v52 }
 0x5a7   : > { %2953 = vrot.lane.b32.xlu0 %v2952_v55, %s3369_s23 }
 0x5a8   : > { %v2939_v59 = vpop.permute.xlu1 %2938 }
 0x5a9   : > { %v2941_v60 = vunpack.i.h.bf16 %v2939_v59  ;;  %v2940_v61 = vunpack.i.l.bf16 %v2939_v59 }
 0x5ab   : > { %v922_v62 = vsel %vm397_vm2, 0.0, %v2941_v60  ;;  %v921_v63 = vsel %vm397_vm2, 0.0, %v2940_v61  ;;  %2963 = vrot.lane.b32.xlu0 %v2952_v55, %s3370_s12  ;;  %vm977_vm2 = vcmask 982016  }
 0x5ac   : > { %v926_v0 = vsel %vm3634_vm4, %v922_v62, %v900_v42  ;;  %v925_v1 = vsel %vm3634_vm4, %v921_v63, %v899_v41  ;;  %vm2434_vm3 = vmpackc.low %vm977_vm2, %vm977_vm2 }
 0x5ad   : > { %v2947_v3 = vpack.i.bf16 %v926_v0, %v925_v1  ;;  %v1004_v4 = vpack.c.bf16 %v926_v0, %v925_v1  ;;  %vm2460_vm4 = vmpackc.low %vm994_vm9, %vm994_vm9 }
 0x5af   : > { %2948 = vrot.lane.b32.xlu1 %v2947_v3, %s3369_s23  ;;  %2973 = vrot.lane.b32.xlu0 %v2952_v55, %s3371_s29 }
 0x5b3   : > { %2958 = vrot.lane.b32.xlu1 %v2947_v3, %s3370_s12  ;;  %2983 = vrot.lane.b32.xlu0 %v2952_v55, %s3372_s13 }
 0x5b7   : > { %2968 = vrot.lane.b32.xlu1 %v2947_v3, %s3371_s29  ;;  %1026 = vperm.xlu0 %2845, %v578_v6  }
 0x5bb   : > { %2978 = vrot.lane.b32.xlu1 %v2947_v3, %s3372_s13  ;;  %1016 = vperm.xlu0 %2845, %v576_v7  }
 0x5bf   : > { %1021 = vperm.xlu1 %2846, %v577_v8  }
 0x5c3   : > { %1011 = vperm.xlu1 %2846, %v575_v9  }
 0x619   : > { %v2954_v11 = vpop.permute.xlu0 %2953 }
 0x61a   : > { %v2956_v15 = vunpack.i.h.bf16 %v2954_v11  ;;  %v2955_v16 = vunpack.i.l.bf16 %v2954_v11 }
 0x61c   : > { %v2438_v19 = vpack.c.bf16 %v2956_v15, %v2955_v16 }
 0x61d   : > { %v2964_v24 = vpop.permute.xlu0 %2963 }
 0x61e   : > { %v2966_v25 = vunpack.i.h.bf16 %v2964_v24  ;;  %v2965_v27 = vunpack.i.l.bf16 %v2964_v24  ;;  %v1124_v24 = vld [vmem:[%s4171_s8 + $0x10] sm:$0xff] }
 0x620   : > { %v2448_v30 = vpack.c.bf16 %v2966_v25, %v2965_v27  ;;  %v1122_v25 = vld [vmem:[%s4171_s8] sm:$0xff] }
 0x621   : > { %v2949_v12 = vpop.permute.xlu1 %2948  ;;  %v2974_v34 = vpop.permute.xlu0 %2973  ;;  %v3323_v27 = vld [vmem:[%s4170_s7 + $0x4] ss:$8 sps:$4 sm:$0xff]  }
 0x622   : > { %v2951_v13 = vunpack.i.h.bf16 %v2949_v12  ;;  %v2950_v14 = vunpack.i.l.bf16 %v2949_v12  ;;  %v2976_v36 = vunpack.i.h.bf16 %v2974_v34  ;;  %v2975_v37 = vunpack.i.l.bf16 %v2974_v34  ;;  %2520 = vmatprep.mubr.msk.bf16.mxu1 %vm1278_vm13, %v3323_v27 }
 0x624   : > { %v2435_v18 = vpack.c.bf16 %v2951_v13, %v2950_v14  ;;  %v2458_v40 = vpack.c.bf16 %v2976_v36, %v2975_v37 }
 0x625   : > { %v2959_v20 = vpop.permute.xlu1 %2958  ;;  %v2984_v43 = vpop.permute.xlu0 %2983 }
 0x626   : > { %2436 = vmatpush1.bf16.msk.msra.mxu0 %vm2434_vm3, %v2435_v18  ;;  %v2961_v21 = vunpack.i.h.bf16 %v2959_v20  ;;  %v2960_v22 = vunpack.i.l.bf16 %v2959_v20  ;;  %v2986_v44 = vunpack.i.h.bf16 %v2984_v43  ;;  %v2985_v45 = vunpack.i.l.bf16 %v2984_v43 }
 0x627   : > { %1055 = vmatprep.subr.bf16.mxu0 %v3367_v2 }
 0x628   : > { %v2443_v28 = vpack.c.bf16 %v2961_v21, %v2960_v22  ;;  %v2464_v47 = vpack.c.bf16 %v2986_v44, %v2985_v45 }
 0x629   : > { %v2969_v29 = vpop.permute.xlu1 %2968 }
 0x62a   : > { %2439 = vmatpush1.bf16.msk.msra.mxu0 %vm2434_vm3, %v2438_v19  ;;  %v2971_v31 = vunpack.i.h.bf16 %v2969_v29  ;;  %v2970_v32 = vunpack.i.l.bf16 %v2969_v29 }
 0x62b   : > { %1057 = vmatprep.subr.bf16.mxu0 %v3367_v2 }
 0x62c   : > { %v2453_v38 = vpack.c.bf16 %v2971_v31, %v2970_v32 }
 0x62d   : > { %v2979_v39 = vpop.permute.xlu1 %2978 }
 0x62e   : > { %1058 = vmatpush1.bf16.msra.mxu0 %v1004_v4  ;;  %v2981_v41 = vunpack.i.h.bf16 %v2979_v39  ;;  %v2980_v42 = vunpack.i.l.bf16 %v2979_v39 }
 0x62f   : > { %1059 = vmatprep.subr.bf16.mxu0 %v3367_v2 }
 0x630   : > { %v2461_v46 = vpack.c.bf16 %v2981_v41, %v2980_v42 }
 0x632   : > { %1060 = vmatpush1.bf16.msra.mxu0 %v1003_v58  ;;  %v1027_v52 = vpop.permute.xlu0 %1026 }
 0x633   : > { %1061 = vmatprep.subr.bf16.mxu0 %v3367_v2 }
 0x636   : > { %2444 = vmatpush1.bf16.msk.msra.mxu0 %vm2442_vm15, %v2443_v28  ;;  %v1017_v62 = vpop.permute.xlu0 %1016 }
 0x637   : > { %1063 = vmatprep.subr.bf16.mxu0 %v3367_v2 }
 0x63a   : > { %2449 = vmatpush1.bf16.msk.msra.mxu0 %vm2442_vm15, %v2448_v30  ;;  %v1022_v51 = vpop.permute.xlu1 %1021  ;;  %vm2492_vm15 = vmneg %vm402_vm1  ;;  %vm4192_vm1 = vcmask 1022976  }
 0x63b   : > { %1065 = vmatprep.subr.bf16.mxu0 %v3367_v2  ;;  %vm3762_vm6 = vmpackc.low %vm2492_vm15, %vm2492_vm15 }
 0x63c   : > { %vm3774_vm10 = vmpackc.low %vm4192_vm1, %vm4192_vm1 }
 0x63e   : > { %2454 = vmatpush1.bf16.msk.msra.mxu0 %vm2452_vm8, %v2453_v38  ;;  %v1012_v55 = vpop.permute.xlu1 %1011 }
 0x63f   : > { %1067 = vmatprep.subr.bf16.mxu0 %v3367_v2 }
 0x642   : > { %2459 = vmatpush1.bf16.msk.msra.mxu0 %vm2452_vm8, %v2458_v40 }
 0x643   : > { %1081 = vmatprep.subr.bf16.mxu0 %v3367_v2 }
 0x646   : > { %2462 = vmatpush2.bf16.msk.msra.mxu0 %vm2460_vm4, %v2461_v46 }
 0x647   : > { %1083 = vmatprep.subr.bf16.mxu0 %v3367_v2 }
 0x64a   : > { %2465 = vmatpush2.bf16.msk.msra.mxu0 %vm2460_vm4, %v2464_v47 }
 0x64b   : > { %1514 = vmatprep.subr.bf16.mxu0 %v3367_v2 }
 0x64d   : > { %1086 = vmatmul.mubr.bf16.vlgmr.msra.gmra.mxu0 %v3317_v48 }
 0x64e   : > { %2467 = vmatprep.mubr.msk.bf16.mxu0 %vm695_vm0, %v3318_v49 }
 0x655   : > { %1094 = vmatmul.mubr.bf16.gmra.mxu0 %v3320_v50 }
 0x70d   : > { %v1087_v58 = vpop.f32.mrf.mxu0 }
 0x70e   : > { %v1088_v59 = vadd.f32 %v1087_v58, %v1012_v55 }
 0x70f   : > { %v1089_v60 = vpop.f32.mrf.mxu0 }
 0x710   : > { %v1106_v61 = vmul.f32 0.01, %v1088_v59  ;;  %vm1102_vm2 = vcmp.gt.f32.partialorder %v1088_v59, 0.0 }
 0x711   : > { %v1090_v63 = vpop.f32.mrf.mxu0 }
 0x712   : > { %v1091_v0 = vadd.f32 %v1090_v63, %v1017_v62  ;;  %v1110_v3 = vsel %vm1102_vm2, %v1088_v59, %v1106_v61 }
 0x713   : > { %v1092_v1 = vpop.f32.mrf.mxu0  ;;  %v3701_v9 = vadd.f32 %v1110_v3, %v3508_v56 }
 0x714   : > { %vm1103_vm3 = vcmp.gt.f32.partialorder %v1091_v0, 0.0  ;;  %v1107_v4 = vmul.f32 0.01, %v1091_v0 }
 0x715   : > { %v1095_v6 = vpop.f32.mrf.mxu0 }
 0x716   : > { %v1111_v7 = vsel %vm1103_vm3, %v1091_v0, %v1107_v4  ;;  %v1096_v8 = vadd.f32 %v1095_v6, %v1022_v51 }
 0x717   : > { %v3704_v10 = vadd.f32 %v1111_v7, %v3510_v57  ;;  %v1097_v11 = vpop.f32.mrf.mxu0 }
 0x718   : > { %v1108_v12 = vmul.f32 0.01, %v1096_v8  ;;  %vm1104_vm0 = vcmp.gt.f32.partialorder %v1096_v8, 0.0 }
 0x719   : > { %v1098_v13 = vpop.f32.mrf.mxu0  ;;  %v2992_v14 = vpack.i.bf16 %v3704_v10, %v3701_v9 }
 0x71a   : > { %v1099_v15 = vadd.f32 %v1098_v13, %v1027_v52  ;;  %v1112_v18 = vsel %vm1104_vm0, %v1096_v8, %v1108_v12 }
 0x71b   : > { %v1100_v16 = vpop.f32.mrf.mxu0  ;;  %2993 = vrot.lane.b32.xlu0 %v2992_v14, %s3362_s25  ;;  %v3710_v56 = vadd.f32 %v1112_v18, %v3504_v53  ;;  %v1232_v53 = vpack.c.bf16 %v3704_v10, %v3701_v9 }
 0x71c   : > { %vm1105_vm12 = vcmp.gt.f32.partialorder %v1099_v15, 0.0  ;;  %v1109_v19 = vmul.f32 0.01, %v1099_v15 }
 0x71e   : > { %v1113_v20 = vsel %vm1105_vm12, %v1099_v15, %v1109_v19 }
 0x71f   : > { %v3713_v57 = vadd.f32 %v1113_v20, %v3506_v54  ;;  %3003 = vrot.lane.b32.xlu0 %v2992_v14, %s3361_s24  ;;  %v1125_v54 = vld [vmem:[%s4171_s8 + $0x18] sm:$0xff] }
 0x721   : > { %v2987_v21 = vpack.i.bf16 %v3713_v57, %v3710_v56  ;;  %v1233_v22 = vpack.c.bf16 %v3713_v57, %v3710_v56 }
 0x723   : > { %2988 = vrot.lane.b32.xlu1 %v2987_v21, %s3362_s25  ;;  %1286 = vmatpush1.bf16.msra.mxu1 %v1233_v22 }
 0x724   : > { %3013 = vrot.lane.b32.xlu0 %v2992_v14, %s3359_s22  ;;  %1287 = vmatprep.subr.bf16.mxu1 %v3367_v2 }
 0x727   : > { %2998 = vrot.lane.b32.xlu1 %v2987_v21, %s3361_s24  ;;  %1288 = vmatpush1.bf16.msra.mxu1 %v1232_v53 }
 0x728   : > { %3023 = vrot.lane.b32.xlu0 %v2992_v14, %s3365_s30  ;;  %1289 = vmatprep.subr.bf16.mxu1 %v3367_v2 }
 0x72b   : > { %3008 = vrot.lane.b32.xlu1 %v2987_v21, %s3359_s22 }
 0x72c   : > { %3033 = vrot.lane.b32.xlu0 %v2992_v14, %s3364_s27 }
 0x72f   : > { %3018 = vrot.lane.b32.xlu1 %v2987_v21, %s3365_s30 }
 0x730   : > { %3043 = vrot.lane.b32.xlu0 %v2992_v14, %s3363_s26 }
 0x733   : > { %3028 = vrot.lane.b32.xlu1 %v2987_v21, %s3364_s27 }
 0x734   : > { %1257 = vperm.xlu0 %2845, %v1125_v54   ;;  %v3321_v54 = vld [vmem:[%s4170_s7] ss:$8 sps:$4 sm:$0xff]  }
 0x737   : > { %3038 = vrot.lane.b32.xlu1 %v2987_v21, %s3363_s26 }
 0x738   : > { %1247 = vperm.xlu0 %2845, %v1123_v23   ;;  %v3324_v23 = vld [vmem:[%s4170_s7 + $0x14] ss:$8 sps:$4 sm:$0xff]  }
 0x73b   : > { %1252 = vperm.xlu1 %2846, %v1124_v24   ;;  %v3326_v24 = vld [vmem:[%s4170_s7 + $0x10] ss:$8 sps:$4 sm:$0xff]  }
 0x73f   : > { %1242 = vperm.xlu1 %2846, %v1122_v25  }
 0x78d   : > { %v2994_v28 = vpop.permute.xlu0 %2993 }
 0x78e   : > { %v2996_v32 = vunpack.i.h.bf16 %v2994_v28  ;;  %v2995_v33 = vunpack.i.l.bf16 %v2994_v28 }
 0x790   : > { %v2480_v37 = vpack.c.bf16 %v2996_v32, %v2995_v33 }
 0x791   : > { %v3004_v40 = vpop.permute.xlu0 %3003 }
 0x792   : > { %v3006_v41 = vunpack.i.h.bf16 %v3004_v40  ;;  %v3005_v42 = vunpack.i.l.bf16 %v3004_v40 }
 0x794   : > { %v2490_v45 = vpack.c.bf16 %v3006_v41, %v3005_v42 }
 0x795   : > { %v2989_v29 = vpop.permute.xlu1 %2988 }
 0x796   : > { %v2991_v30 = vunpack.i.h.bf16 %v2989_v29  ;;  %v2990_v31 = vunpack.i.l.bf16 %v2989_v29  ;;  %v3014_v48 = vpop.permute.xlu0 %3013 }
 0x797   : > { %v3016_v50 = vunpack.i.h.bf16 %v3014_v48  ;;  %v3015_v51 = vunpack.i.l.bf16 %v3014_v48 }
 0x798   : > { %v2475_v34 = vpack.c.bf16 %v2991_v30, %v2990_v31 }
 0x799   : > { %v2999_v36 = vpop.permute.xlu1 %2998  ;;  %v2500_v58 = vpack.c.bf16 %v3016_v50, %v3015_v51 }
 0x79a   : > { %2476 = vmatpush1.bf16.msk.msra.mxu1 %vm3558_vm7, %v2475_v34  ;;  %v3001_v38 = vunpack.i.h.bf16 %v2999_v36  ;;  %v3000_v39 = vunpack.i.l.bf16 %v2999_v36  ;;  %v3024_v61 = vpop.permute.xlu0 %3023 }
 0x79b   : > { %1291 = vmatprep.subr.bf16.mxu1 %v3367_v2  ;;  %v3026_v63 = vunpack.i.h.bf16 %v3024_v61  ;;  %v3025_v0 = vunpack.i.l.bf16 %v3024_v61  ;;  %v2527_v61 = vld [vmem:[%s4171_s8 + $0x28] sm:$0xff] }
 0x79c   : > { %v2485_v43 = vpack.c.bf16 %v3001_v38, %v3000_v39 }
 0x79d   : > { %v3009_v44 = vpop.permute.xlu1 %3008  ;;  %v2506_v4 = vpack.c.bf16 %v3026_v63, %v3025_v0  ;;  %v2528_v63 = vld [vmem:[%s4171_s8 + $0x30] sm:$0xff]  ;;  %v2526_v0 = vld [vmem:[%s4171_s8 + $0x20] sm:$0xff] }
 0x79e   : > { %2481 = vmatpush1.bf16.msk.msra.mxu1 %vm3558_vm7, %v2480_v37  ;;  %v3011_v46 = vunpack.i.h.bf16 %v3009_v44  ;;  %v3010_v47 = vunpack.i.l.bf16 %v3009_v44  ;;  %v3034_v8 = vpop.permute.xlu0 %3033 }
 0x79f   : > { %1293 = vmatprep.subr.bf16.mxu1 %v3367_v2  ;;  %v3036_v11 = vunpack.i.h.bf16 %v3034_v8  ;;  %v3035_v12 = vunpack.i.l.bf16 %v3034_v8 }
 0x7a0   : > { %v2495_v52 = vpack.c.bf16 %v3011_v46, %v3010_v47 }
 0x7a1   : > { %v3019_v55 = vpop.permute.xlu1 %3018  ;;  %v2512_v15 = vpack.c.bf16 %v3036_v11, %v3035_v12 }
 0x7a2   : > { %2486 = vmatpush1.bf16.msk.msra.mxu1 %vm3569_vm11, %v2485_v43  ;;  %v3021_v59 = vunpack.i.h.bf16 %v3019_v55  ;;  %v3020_v60 = vunpack.i.l.bf16 %v3019_v55  ;;  %v3044_v19 = vpop.permute.xlu0 %3043 }
 0x7a3   : > { %1295 = vmatprep.subr.bf16.mxu1 %v3367_v2  ;;  %v3046_v20 = vunpack.i.h.bf16 %v3044_v19  ;;  %v3045_v21 = vunpack.i.l.bf16 %v3044_v19 }
 0x7a4   : > { %v2503_v1 = vpack.c.bf16 %v3021_v59, %v3020_v60  ;;  %v2529_v60 = vld [vmem:[%s4171_s8 + $0x38] sm:$0xff] }
 0x7a5   : > { %v3029_v3 = vpop.permute.xlu1 %3028  ;;  %v2518_v53 = vpack.c.bf16 %v3046_v20, %v3045_v21 }
 0x7a6   : > { %2491 = vmatpush1.bf16.msk.msra.mxu1 %vm3569_vm11, %v2490_v45  ;;  %v3031_v6 = vunpack.i.h.bf16 %v3029_v3  ;;  %v3030_v7 = vunpack.i.l.bf16 %v3029_v3 }
 0x7a7   : > { %1297 = vmatprep.subr.bf16.mxu1 %v3367_v2 }
 0x7a8   : > { %v2509_v13 = vpack.c.bf16 %v3031_v6, %v3030_v7 }
 0x7a9   : > { %v3039_v14 = vpop.permute.xlu1 %3038 }
 0x7aa   : > { %2496 = vmatpush1.bf16.msk.msra.mxu1 %vm3762_vm6, %v2495_v52  ;;  %v3041_v16 = vunpack.i.h.bf16 %v3039_v14  ;;  %v3040_v18 = vunpack.i.l.bf16 %v3039_v14 }
 0x7ab   : > { %1299 = vmatprep.subr.bf16.mxu1 %v3367_v2 }
 0x7ac   : > { %v2515_v22 = vpack.c.bf16 %v3041_v16, %v3040_v18 }
 0x7ae   : > { %2501 = vmatpush1.bf16.msk.msra.mxu1 %vm3762_vm6, %v2500_v58 }
 0x7af   : > { %1305 = vmatprep.subr.bf16.mxu1 %v3367_v2  ;;  %v1258_v27 = vpop.permute.xlu0 %1257 }
 0x7b2   : > { %2504 = vmatpush2.bf16.msk.msra.mxu1 %vm3774_vm10, %v2503_v1  ;;  %v3329_v1 = vld [vmem:[%s4170_s7 + $0x24] ss:$8 sps:$4 sm:$0xff]  }
 0x7b3   : > { %1307 = vmatprep.subr.bf16.mxu1 %v3367_v2  ;;  %v1248_v32 = vpop.permute.xlu0 %1247  ;;  %2582 = vmatprep.mubr.msk.bf16.mxu0 %vm1278_vm13, %v3329_v1 }
 0x7b6   : > { %2507 = vmatpush2.bf16.msk.msra.mxu1 %vm3774_vm10, %v2506_v4  ;;  %v1253_v25 = vpop.permute.xlu1 %1252 }
 0x7b7   : > { %1309 = vmatprep.subr.bf16.mxu1 %v3367_v2 }
 0x7ba   : > { %2510 = vmatpush2.bf16.msk.msra.mxu1 %vm3581_vm14, %v2509_v13  ;;  %v1243_v28 = vpop.permute.xlu1 %1242 }
 0x7bb   : > { %1311 = vmatprep.subr.bf16.mxu1 %v3367_v2 }
 0x7be   : > { %2513 = vmatpush2.bf16.msk.msra.mxu1 %vm3581_vm14, %v2512_v15 }
 0x7bf   : > { %1313 = vmatprep.subr.bf16.mxu1 %v3367_v2 }
 0x7c2   : > { %2516 = vmatpush2.bf16.msk.msra.mxu1 %vm3542_vm5, %v2515_v22 }
 0x7c3   : > { %1315 = vmatprep.subr.bf16.mxu1 %v3367_v2 }
 0x7c6   : > { %2519 = vmatpush2.bf16.msk.msra.mxu1 %vm3542_vm5, %v2518_v53 }
 0x7c7   : > { %1735 = vmatprep.subr.bf16.mxu1 %v3367_v2 }
 0x7c9   : > { %1318 = vmatmul.mubr.bf16.vlgmr.msra.gmra.mxu1 %v3321_v54 }
 0x7ca   : > { %2521 = vmatprep.mubr.msk.bf16.mxu1 %vm1278_vm13, %v3324_v23 }
 0x7d1   : > { %1326 = vmatmul.mubr.bf16.gmra.mxu1 %v3326_v24 }
 0x889   : > { %v1319_v29 = vpop.f32.mrf.mxu1 }
 0x88a   : > { %v1320_v30 = vadd.f32 %v1319_v29, %v1243_v28 }
 0x88b   : > { %v1321_v31 = vpop.f32.mrf.mxu1 }
 0x88c   : > { %v1338_v34 = vmul.f32 0.01, %v1320_v30  ;;  %vm1334_vm8 = vcmp.gt.f32.partialorder %v1320_v30, 0.0 }
 0x88d   : > { %v1322_v33 = vpop.f32.mrf.mxu1 }
 0x88e   : > { %v1323_v36 = vadd.f32 %v1322_v33, %v1248_v32  ;;  %v1342_v40 = vsel %vm1334_vm8, %v1320_v30, %v1338_v34 }
 0x88f   : > { %v1324_v37 = vpop.f32.mrf.mxu1 }
 0x890   : > { %vm1335_vm9 = vcmp.gt.f32.partialorder %v1323_v36, 0.0  ;;  %v1339_v38 = vmul.f32 0.01, %v1323_v36 }
 0x891   : > { %v1327_v39 = vpop.f32.mrf.mxu1 }
 0x892   : > { %v1343_v41 = vsel %vm1335_vm9, %v1323_v36, %v1339_v38  ;;  %v1328_v42 = vadd.f32 %v1327_v39, %v1253_v25 }
 0x893   : > { %v1329_v43 = vpop.f32.mrf.mxu1  ;;  %v3052_v44 = vpack.i.bf16 %v1343_v41, %v1342_v40  ;;  %v1462_v59 = vpack.c.bf16 %v1343_v41, %v1342_v40 }
 0x894   : > { %v1340_v46 = vmul.f32 0.01, %v1328_v42  ;;  %vm1336_vm4 = vcmp.gt.f32.partialorder %v1328_v42, 0.0 }
 0x895   : > { %v1330_v45 = vpop.f32.mrf.mxu1  ;;  %3053 = vrot.lane.b32.xlu0 %v3052_v44, %s3362_s25 }
 0x896   : > { %v1331_v47 = vadd.f32 %v1330_v45, %v1258_v27  ;;  %v1344_v51 = vsel %vm1336_vm4, %v1328_v42, %v1340_v46 }
 0x897   : > { %v1332_v48 = vpop.f32.mrf.mxu1 }
 0x898   : > { %vm1337_vm2 = vcmp.gt.f32.partialorder %v1331_v47, 0.0  ;;  %v1341_v50 = vmul.f32 0.01, %v1331_v47 }
 0x899   : > { %3063 = vrot.lane.b32.xlu0 %v3052_v44, %s3361_s24 }
 0x89a   : > { %v1345_v52 = vsel %vm1337_vm2, %v1331_v47, %v1341_v50 }
 0x89b   : > { %v3047_v55 = vpack.i.bf16 %v1345_v52, %v1344_v51  ;;  %v1463_v58 = vpack.c.bf16 %v1345_v52, %v1344_v51 }
 0x89d   : > { %3048 = vrot.lane.b32.xlu1 %v3047_v55, %s3362_s25  ;;  %1515 = vmatpush1.bf16.msra.mxu0 %v1463_v58 }
 0x89e   : > { %3073 = vrot.lane.b32.xlu0 %v3052_v44, %s3359_s22  ;;  %1516 = vmatprep.subr.bf16.mxu0 %v3367_v2 }
 0x8a1   : > { %3058 = vrot.lane.b32.xlu1 %v3047_v55, %s3361_s24  ;;  %1517 = vmatpush1.bf16.msra.mxu0 %v1462_v59 }
 0x8a2   : > { %3083 = vrot.lane.b32.xlu0 %v3052_v44, %s3365_s30  ;;  %1518 = vmatprep.subr.bf16.mxu0 %v3367_v2 }
 0x8a5   : > { %3068 = vrot.lane.b32.xlu1 %v3047_v55, %s3359_s22 }
 0x8a6   : > { %3093 = vrot.lane.b32.xlu0 %v3052_v44, %s3364_s27 }
 0x8a9   : > { %3078 = vrot.lane.b32.xlu1 %v3047_v55, %s3365_s30 }
 0x8aa   : > { %3103 = vrot.lane.b32.xlu0 %v3052_v44, %s3363_s26 }
 0x8ad   : > { %3088 = vrot.lane.b32.xlu1 %v3047_v55, %s3364_s27 }
 0x8ae   : > { %1487 = vperm.xlu0 %2845, %v2529_v60   ;;  %v3327_v60 = vld [vmem:[%s4170_s7 + $0x20] ss:$8 sps:$4 sm:$0xff]  }
 0x8b1   : > { %3098 = vrot.lane.b32.xlu1 %v3047_v55, %s3363_s26 }
 0x8b2   : > { %1477 = vperm.xlu0 %2845, %v2527_v61   ;;  %v3330_v61 = vld [vmem:[%s4170_s7 + $0x34] ss:$8 sps:$4 sm:$0xff]  }
 0x8b5   : > { %1482 = vperm.xlu1 %2846, %v2528_v63   ;;  %v3332_v63 = vld [vmem:[%s4170_s7 + $0x30] ss:$8 sps:$4 sm:$0xff]  }
 0x8b9   : > { %1472 = vperm.xlu1 %2846, %v2526_v0  }
 0x907   : > { %v3054_v3 = vpop.permute.xlu0 %3053 }
 0x908   : > { %v3056_v8 = vunpack.i.h.bf16 %v3054_v3  ;;  %v3055_v11 = vunpack.i.l.bf16 %v3054_v3 }
 0x90a   : > { %v2542_v14 = vpack.c.bf16 %v3056_v8, %v3055_v11 }
 0x90b   : > { %v3064_v18 = vpop.permute.xlu0 %3063 }
 0x90c   : > { %v3066_v19 = vunpack.i.h.bf16 %v3064_v18  ;;  %v3065_v20 = vunpack.i.l.bf16 %v3064_v18 }
 0x90e   : > { %v2552_v53 = vpack.c.bf16 %v3066_v19, %v3065_v20 }
 0x90f   : > { %v3049_v4 = vpop.permute.xlu1 %3048 }
 0x910   : > { %v3051_v6 = vunpack.i.h.bf16 %v3049_v4  ;;  %v3050_v7 = vunpack.i.l.bf16 %v3049_v4  ;;  %v3074_v24 = vpop.permute.xlu0 %3073 }
 0x911   : > { %v3076_v25 = vunpack.i.h.bf16 %v3074_v24  ;;  %v3075_v27 = vunpack.i.l.bf16 %v3074_v24 }
 0x912   : > { %v2537_v12 = vpack.c.bf16 %v3051_v6, %v3050_v7 }
 0x913   : > { %v3059_v13 = vpop.permute.xlu1 %3058  ;;  %v2562_v30 = vpack.c.bf16 %v3076_v25, %v3075_v27 }
 0x914   : > { %2538 = vmatpush1.bf16.msk.msra.mxu0 %vm3558_vm7, %v2537_v12  ;;  %v3061_v15 = vunpack.i.h.bf16 %v3059_v13  ;;  %v3060_v16 = vunpack.i.l.bf16 %v3059_v13  ;;  %v3084_v33 = vpop.permute.xlu0 %3083 }
 0x915   : > { %1520 = vmatprep.subr.bf16.mxu0 %v3367_v2  ;;  %v3086_v34 = vunpack.i.h.bf16 %v3084_v33  ;;  %v3085_v36 = vunpack.i.l.bf16 %v3084_v33 }
 0x916   : > { %v2547_v21 = vpack.c.bf16 %v3061_v15, %v3060_v16 }
 0x917   : > { %v3069_v22 = vpop.permute.xlu1 %3068  ;;  %v2568_v39 = vpack.c.bf16 %v3086_v34, %v3085_v36 }
 0x918   : > { %2543 = vmatpush1.bf16.msk.msra.mxu0 %vm3558_vm7, %v2542_v14  ;;  %v3071_v54 = vunpack.i.h.bf16 %v3069_v22  ;;  %v3070_v23 = vunpack.i.l.bf16 %v3069_v22  ;;  %v3094_v42 = vpop.permute.xlu0 %3093 }
 0x919   : > { %1522 = vmatprep.subr.bf16.mxu0 %v3367_v2  ;;  %v3096_v43 = vunpack.i.h.bf16 %v3094_v42  ;;  %v3095_v44 = vunpack.i.l.bf16 %v3094_v42 }
 0x91a   : > { %v2557_v28 = vpack.c.bf16 %v3071_v54, %v3070_v23 }
 0x91b   : > { %v3079_v29 = vpop.permute.xlu1 %3078  ;;  %v2574_v47 = vpack.c.bf16 %v3096_v43, %v3095_v44 }
 0x91c   : > { %2548 = vmatpush1.bf16.msk.msra.mxu0 %vm3569_vm11, %v2547_v21  ;;  %v3081_v31 = vunpack.i.h.bf16 %v3079_v29  ;;  %v3080_v32 = vunpack.i.l.bf16 %v3079_v29  ;;  %v3104_v51 = vpop.permute.xlu0 %3103  ;;  %v2589_v29 = vld [vmem:[%s4171_s8 + $0x48] sm:$0xff] }
 0x91d   : > { %1524 = vmatprep.subr.bf16.mxu0 %v3367_v2  ;;  %v3106_v52 = vunpack.i.h.bf16 %v3104_v51  ;;  %v3105_v55 = vunpack.i.l.bf16 %v3104_v51 }
 0x91e   : > { %v2565_v37 = vpack.c.bf16 %v3081_v31, %v3080_v32  ;;  %v2588_v31 = vld [vmem:[%s4171_s8 + $0x40] sm:$0xff] }
 0x91f   : > { %v3089_v38 = vpop.permute.xlu1 %3088  ;;  %v2580_v59 = vpack.c.bf16 %v3106_v52, %v3105_v55  ;;  %v3335_v32 = vld [vmem:[%s4170_s7 + $0x44] ss:$8 sps:$4 sm:$0xff]  }
 0x920   : > { %2553 = vmatpush1.bf16.msk.msra.mxu0 %vm3569_vm11, %v2552_v53  ;;  %v3091_v40 = vunpack.i.h.bf16 %v3089_v38  ;;  %v3090_v41 = vunpack.i.l.bf16 %v3089_v38  ;;  %2644 = vmatprep.mubr.msk.bf16.mxu1 %vm1278_vm13, %v3335_v32  ;;  %v3333_v32 = vld [vmem:[%s4170_s7 + $0x40] ss:$8 sps:$4 sm:$0xff]  }
 0x921   : > { %1526 = vmatprep.subr.bf16.mxu0 %v3367_v2 }
 0x922   : > { %v2571_v45 = vpack.c.bf16 %v3091_v40, %v3090_v41 }
 0x923   : > { %v3099_v46 = vpop.permute.xlu1 %3098 }
 0x924   : > { %2558 = vmatpush1.bf16.msk.msra.mxu0 %vm3762_vm6, %v2557_v28  ;;  %v3101_v48 = vunpack.i.h.bf16 %v3099_v46  ;;  %v3100_v50 = vunpack.i.l.bf16 %v3099_v46  ;;  %v2591_v28 = vld [vmem:[%s4171_s8 + $0x58] sm:$0xff] }
 0x925   : > { %1528 = vmatprep.subr.bf16.mxu0 %v3367_v2 }
 0x926   : > { %v2577_v58 = vpack.c.bf16 %v3101_v48, %v3100_v50 }
 0x928   : > { %2563 = vmatpush1.bf16.msk.msra.mxu0 %vm3762_vm6, %v2562_v30  ;;  %v2590_v30 = vld [vmem:[%s4171_s8 + $0x50] sm:$0xff] }
 0x929   : > { %1534 = vmatprep.subr.bf16.mxu0 %v3367_v2  ;;  %v1488_v1 = vpop.permute.xlu0 %1487 }
 0x92c   : > { %2566 = vmatpush2.bf16.msk.msra.mxu0 %vm3774_vm10, %v2565_v37 }
 0x92d   : > { %1536 = vmatprep.subr.bf16.mxu0 %v3367_v2  ;;  %v1478_v8 = vpop.permute.xlu0 %1477 }
 0x930   : > { %2569 = vmatpush2.bf16.msk.msra.mxu0 %vm3774_vm10, %v2568_v39  ;;  %v1483_v0 = vpop.permute.xlu1 %1482 }
 0x931   : > { %1538 = vmatprep.subr.bf16.mxu0 %v3367_v2 }
 0x934   : > { %2572 = vmatpush2.bf16.msk.msra.mxu0 %vm3581_vm14, %v2571_v45  ;;  %v1473_v4 = vpop.permute.xlu1 %1472 }
 0x935   : > { %1540 = vmatprep.subr.bf16.mxu0 %v3367_v2 }
 0x938   : > { %2575 = vmatpush2.bf16.msk.msra.mxu0 %vm3581_vm14, %v2574_v47 }
 0x939   : > { %1542 = vmatprep.subr.bf16.mxu0 %v3367_v2 }
 0x93c   : > { %2578 = vmatpush2.bf16.msk.msra.mxu0 %vm3542_vm5, %v2577_v58 }
 0x93d   : > { %1544 = vmatprep.subr.bf16.mxu0 %v3367_v2 }
 0x940   : > { %2581 = vmatpush2.bf16.msk.msra.mxu0 %vm3542_vm5, %v2580_v59 }
 0x941   : > { %1964 = vmatprep.subr.bf16.mxu0 %v3367_v2 }
 0x943   : > { %1547 = vmatmul.mubr.bf16.vlgmr.msra.gmra.mxu0 %v3327_v60 }
 0x944   : > { %2583 = vmatprep.mubr.msk.bf16.mxu0 %vm1278_vm13, %v3330_v61 }
 0x94b   : > { %1555 = vmatmul.mubr.bf16.gmra.mxu0 %v3332_v63 }
 0xa03   : > { %v1548_v3 = vpop.f32.mrf.mxu0 }
 0xa04   : > { %v1549_v7 = vadd.f32 %v1548_v3, %v1473_v4 }
 0xa05   : > { %v1550_v6 = vpop.f32.mrf.mxu0 }
 0xa06   : > { %v3884_v14 = vadd.f32 %v1549_v7, %v3701_v9 }
 0xa07   : > { %v1551_v11 = vpop.f32.mrf.mxu0 }
 0xa08   : > { %v1552_v12 = vadd.f32 %v1551_v11, %v1478_v8 }
 0xa09   : > { %v1553_v13 = vpop.f32.mrf.mxu0 }
 0xa0a   : > { %v3887_v15 = vadd.f32 %v1552_v12, %v3704_v10 }
 0xa0b   : > { %v1556_v16 = vpop.f32.mrf.mxu0 }
 0xa0c   : > { %v3112_v18 = vpack.i.bf16 %v3887_v15, %v3884_v14  ;;  %v1557_v20 = vadd.f32 %v1556_v16, %v1483_v0  ;;  %v1683_v27 = vpack.c.bf16 %v3887_v15, %v3884_v14 }
 0xa0d   : > { %v1558_v19 = vpop.f32.mrf.mxu0 }
 0xa0e   : > { %3113 = vrot.lane.b32.xlu0 %v3112_v18, %s3362_s25  ;;  %v3893_v54 = vadd.f32 %v1557_v20, %v3710_v56 }
 0xa0f   : > { %v1559_v21 = vpop.f32.mrf.mxu0 }
 0xa10   : > { %v1560_v22 = vadd.f32 %v1559_v21, %v1488_v1 }
 0xa11   : > { %v1561_v53 = vpop.f32.mrf.mxu0 }
 0xa12   : > { %v3896_v23 = vadd.f32 %v1560_v22, %v3713_v57  ;;  %3123 = vrot.lane.b32.xlu0 %v3112_v18, %s3361_s24 }
 0xa14   : > { %v3107_v24 = vpack.i.bf16 %v3896_v23, %v3893_v54  ;;  %v1684_v25 = vpack.c.bf16 %v3896_v23, %v3893_v54 }
 0xa16   : > { %3108 = vrot.lane.b32.xlu1 %v3107_v24, %s3362_s25  ;;  %1736 = vmatpush1.bf16.msra.mxu1 %v1684_v25 }
 0xa17   : > { %3133 = vrot.lane.b32.xlu0 %v3112_v18, %s3359_s22  ;;  %1737 = vmatprep.subr.bf16.mxu1 %v3367_v2 }
 0xa1a   : > { %3118 = vrot.lane.b32.xlu1 %v3107_v24, %s3361_s24  ;;  %1738 = vmatpush1.bf16.msra.mxu1 %v1683_v27 }
 0xa1b   : > { %3143 = vrot.lane.b32.xlu0 %v3112_v18, %s3365_s30  ;;  %1739 = vmatprep.subr.bf16.mxu1 %v3367_v2 }
 0xa1e   : > { %3128 = vrot.lane.b32.xlu1 %v3107_v24, %s3359_s22 }
 0xa1f   : > { %3153 = vrot.lane.b32.xlu0 %v3112_v18, %s3364_s27 }
 0xa22   : > { %3138 = vrot.lane.b32.xlu1 %v3107_v24, %s3365_s30 }
 0xa23   : > { %3163 = vrot.lane.b32.xlu0 %v3112_v18, %s3363_s26 }
 0xa26   : > { %3148 = vrot.lane.b32.xlu1 %v3107_v24, %s3364_s27 }
 0xa27   : > { %1708 = vperm.xlu0 %2845, %v2591_v28  }
 0xa2a   : > { %3158 = vrot.lane.b32.xlu1 %v3107_v24, %s3363_s26 }
 0xa2b   : > { %1698 = vperm.xlu0 %2845, %v2589_v29  }
 0xa2e   : > { %1703 = vperm.xlu1 %2846, %v2590_v30  }
 0xa32   : > { %1693 = vperm.xlu1 %2846, %v2588_v31  }
 0xa80   : > { %v3114_v33 = vpop.permute.xlu0 %3113 }
 0xa81   : > { %v3116_v38 = vunpack.i.h.bf16 %v3114_v33  ;;  %v3115_v39 = vunpack.i.l.bf16 %v3114_v33  ;;  %v3336_v33 = vld [vmem:[%s4170_s7 + $0x54] ss:$8 sps:$4 sm:$0xff]  }
 0xa83   : > { %v2604_v42 = vpack.c.bf16 %v3116_v38, %v3115_v39 }
 0xa84   : > { %v3124_v45 = vpop.permute.xlu0 %3123 }
 0xa85   : > { %v3126_v46 = vunpack.i.h.bf16 %v3124_v45  ;;  %v3125_v47 = vunpack.i.l.bf16 %v3124_v45 }
 0xa87   : > { %v2614_v51 = vpack.c.bf16 %v3126_v46, %v3125_v47 }
 0xa88   : > { %v3109_v34 = vpop.permute.xlu1 %3108 }
 0xa89   : > { %v3111_v36 = vunpack.i.h.bf16 %v3109_v34  ;;  %v3110_v37 = vunpack.i.l.bf16 %v3109_v34  ;;  %v3134_v58 = vpop.permute.xlu0 %3133  ;;  %v3338_v34 = vld [vmem:[%s4170_s7 + $0x50] ss:$8 sps:$4 sm:$0xff]  }
 0xa8a   : > { %v3136_v59 = vunpack.i.h.bf16 %v3134_v58  ;;  %v3135_v60 = vunpack.i.l.bf16 %v3134_v58 }
 0xa8b   : > { %v2599_v40 = vpack.c.bf16 %v3111_v36, %v3110_v37 }
 0xa8c   : > { %v3119_v41 = vpop.permute.xlu1 %3118  ;;  %v2624_v0 = vpack.c.bf16 %v3136_v59, %v3135_v60 }
 0xa8d   : > { %2600 = vmatpush1.bf16.msk.msra.mxu1 %vm3558_vm7, %v2599_v40  ;;  %v3121_v43 = vunpack.i.h.bf16 %v3119_v41  ;;  %v3120_v44 = vunpack.i.l.bf16 %v3119_v41  ;;  %v3144_v4 = vpop.permute.xlu0 %3143 }
 0xa8e   : > { %1741 = vmatprep.subr.bf16.mxu1 %v3367_v2  ;;  %v3146_v6 = vunpack.i.h.bf16 %v3144_v4  ;;  %v3145_v7 = vunpack.i.l.bf16 %v3144_v4 }
 0xa8f   : > { %v2609_v48 = vpack.c.bf16 %v3121_v43, %v3120_v44 }
 0xa90   : > { %v3129_v50 = vpop.permute.xlu1 %3128  ;;  %v2630_v12 = vpack.c.bf16 %v3146_v6, %v3145_v7 }
 0xa91   : > { %2605 = vmatpush1.bf16.msk.msra.mxu1 %vm3558_vm7, %v2604_v42  ;;  %v3131_v52 = vunpack.i.h.bf16 %v3129_v50  ;;  %v3130_v55 = vunpack.i.l.bf16 %v3129_v50  ;;  %v3154_v18 = vpop.permute.xlu0 %3153 }
 0xa92   : > { %1743 = vmatprep.subr.bf16.mxu1 %v3367_v2  ;;  %v3156_v19 = vunpack.i.h.bf16 %v3154_v18  ;;  %v3155_v20 = vunpack.i.l.bf16 %v3154_v18 }
 0xa93   : > { %v2619_v61 = vpack.c.bf16 %v3131_v52, %v3130_v55 }
 0xa94   : > { %v3139_v63 = vpop.permute.xlu1 %3138  ;;  %v2636_v53 = vpack.c.bf16 %v3156_v19, %v3155_v20 }
 0xa95   : > { %2610 = vmatpush1.bf16.msk.msra.mxu1 %vm3569_vm11, %v2609_v48  ;;  %v3141_v1 = vunpack.i.h.bf16 %v3139_v63  ;;  %v3140_v3 = vunpack.i.l.bf16 %v3139_v63  ;;  %v3164_v27 = vpop.permute.xlu0 %3163 }
 0xa96   : > { %1745 = vmatprep.subr.bf16.mxu1 %v3367_v2  ;;  %v3166_v28 = vunpack.i.h.bf16 %v3164_v27  ;;  %v3165_v29 = vunpack.i.l.bf16 %v3164_v27 }
 0xa97   : > { %v2627_v8 = vpack.c.bf16 %v3141_v1, %v3140_v3 }
 0xa98   : > { %v3149_v11 = vpop.permute.xlu1 %3148  ;;  %v2642_v31 = vpack.c.bf16 %v3166_v28, %v3165_v29 }
 0xa99   : > { %2615 = vmatpush1.bf16.msk.msra.mxu1 %vm3569_vm11, %v2614_v51  ;;  %v3151_v13 = vunpack.i.h.bf16 %v3149_v11  ;;  %v3150_v16 = vunpack.i.l.bf16 %v3149_v11  ;;  %v2651_v11 = vld [vmem:[%s4171_s8 + $0x68] sm:$0xff] }
 0xa9a   : > { %1747 = vmatprep.subr.bf16.mxu1 %v3367_v2 }
 0xa9b   : > { %v2633_v21 = vpack.c.bf16 %v3151_v13, %v3150_v16  ;;  %v2650_v13 = vld [vmem:[%s4171_s8 + $0x60] sm:$0xff] }
 0xa9c   : > { %v3159_v22 = vpop.permute.xlu1 %3158  ;;  %v3341_v16 = vld [vmem:[%s4170_s7 + $0x64] ss:$8 sps:$4 sm:$0xff]  }
 0xa9d   : > { %2620 = vmatpush1.bf16.msk.msra.mxu1 %vm3762_vm6, %v2619_v61  ;;  %v3161_v24 = vunpack.i.h.bf16 %v3159_v22  ;;  %v3160_v25 = vunpack.i.l.bf16 %v3159_v22  ;;  %2706 = vmatprep.mubr.msk.bf16.mxu0 %vm1278_vm13, %v3341_v16  ;;  %v3339_v16 = vld [vmem:[%s4170_s7 + $0x60] ss:$8 sps:$4 sm:$0xff]  }
 0xa9e   : > { %1749 = vmatprep.subr.bf16.mxu1 %v3367_v2 }
 0xa9f   : > { %v2639_v30 = vpack.c.bf16 %v3161_v24, %v3160_v25 }
 0xaa1   : > { %2625 = vmatpush1.bf16.msk.msra.mxu1 %vm3762_vm6, %v2624_v0 }
 0xaa2   : > { %1755 = vmatprep.subr.bf16.mxu1 %v3367_v2  ;;  %v1709_v37 = vpop.permute.xlu0 %1708 }
 0xaa5   : > { %2628 = vmatpush2.bf16.msk.msra.mxu1 %vm3774_vm10, %v2627_v8  ;;  %v2653_v8 = vld [vmem:[%s4171_s8 + $0x78] sm:$0xff] }
 0xaa6   : > { %1757 = vmatprep.subr.bf16.mxu1 %v3367_v2  ;;  %v1699_v42 = vpop.permute.xlu0 %1698 }
 0xaa9   : > { %2631 = vmatpush2.bf16.msk.msra.mxu1 %vm3774_vm10, %v2630_v12  ;;  %v1704_v36 = vpop.permute.xlu1 %1703  ;;  %v2652_v12 = vld [vmem:[%s4171_s8 + $0x70] sm:$0xff] }
 0xaaa   : > { %1759 = vmatprep.subr.bf16.mxu1 %v3367_v2 }
 0xaad   : > { %2634 = vmatpush2.bf16.msk.msra.mxu1 %vm3581_vm14, %v2633_v21  ;;  %v1694_v38 = vpop.permute.xlu1 %1693 }
 0xaae   : > { %1761 = vmatprep.subr.bf16.mxu1 %v3367_v2 }
 0xab1   : > { %2637 = vmatpush2.bf16.msk.msra.mxu1 %vm3581_vm14, %v2636_v53 }
 0xab2   : > { %1763 = vmatprep.subr.bf16.mxu1 %v3367_v2 }
 0xab5   : > { %2640 = vmatpush2.bf16.msk.msra.mxu1 %vm3542_vm5, %v2639_v30 }
 0xab6   : > { %1765 = vmatprep.subr.bf16.mxu1 %v3367_v2 }
 0xab9   : > { %2643 = vmatpush2.bf16.msk.msra.mxu1 %vm3542_vm5, %v2642_v31 }
 0xaba   : > { %2185 = vmatprep.subr.bf16.mxu1 %v3367_v2 }
 0xabc   : > { %1768 = vmatmul.mubr.bf16.vlgmr.msra.gmra.mxu1 %v3333_v32 }
 0xabd   : > { %2645 = vmatprep.mubr.msk.bf16.mxu1 %vm1278_vm13, %v3336_v33 }
 0xac4   : > { %1776 = vmatmul.mubr.bf16.gmra.mxu1 %v3338_v34 }
 0xb7c   : > { %v1769_v39 = vpop.f32.mrf.mxu1 }
 0xb7d   : > { %v1770_v40 = vadd.f32 %v1769_v39, %v1694_v38 }
 0xb7e   : > { %v1771_v41 = vpop.f32.mrf.mxu1 }
 0xb7f   : > { %v1788_v44 = vmul.f32 0.01, %v1770_v40  ;;  %vm1784_vm3 = vcmp.gt.f32.partialorder %v1770_v40, 0.0 }
 0xb80   : > { %v1772_v43 = vpop.f32.mrf.mxu1 }
 0xb81   : > { %v1773_v45 = vadd.f32 %v1772_v43, %v1699_v42  ;;  %v1792_v50 = vsel %vm1784_vm3, %v1770_v40, %v1788_v44 }
 0xb82   : > { %v1774_v46 = vpop.f32.mrf.mxu1 }
 0xb83   : > { %vm1785_vm0 = vcmp.gt.f32.partialorder %v1773_v45, 0.0  ;;  %v1789_v47 = vmul.f32 0.01, %v1773_v45 }
 0xb84   : > { %v1777_v48 = vpop.f32.mrf.mxu1 }
 0xb85   : > { %v1793_v51 = vsel %vm1785_vm0, %v1773_v45, %v1789_v47  ;;  %v1778_v52 = vadd.f32 %v1777_v48, %v1704_v36 }
 0xb86   : > { %v1779_v55 = vpop.f32.mrf.mxu1  ;;  %v3172_v58 = vpack.i.bf16 %v1793_v51, %v1792_v50  ;;  %v1912_v7 = vpack.c.bf16 %v1793_v51, %v1792_v50 }
 0xb87   : > { %v1790_v60 = vmul.f32 0.01, %v1778_v52  ;;  %vm1786_vm12 = vcmp.gt.f32.partialorder %v1778_v52, 0.0 }
 0xb88   : > { %v1780_v59 = vpop.f32.mrf.mxu1  ;;  %3173 = vrot.lane.b32.xlu0 %v3172_v58, %s3362_s25 }
 0xb89   : > { %v1781_v61 = vadd.f32 %v1780_v59, %v1709_v37  ;;  %v1794_v1 = vsel %vm1786_vm12, %v1778_v52, %v1790_v60 }
 0xb8a   : > { %v1782_v63 = vpop.f32.mrf.mxu1 }
 0xb8b   : > { %vm1787_vm15 = vcmp.gt.f32.partialorder %v1781_v61, 0.0  ;;  %v1791_v0 = vmul.f32 0.01, %v1781_v61 }
 0xb8c   : > { %3183 = vrot.lane.b32.xlu0 %v3172_v58, %s3361_s24 }
 0xb8d   : > { %v1795_v3 = vsel %vm1787_vm15, %v1781_v61, %v1791_v0 }
 0xb8e   : > { %v3167_v4 = vpack.i.bf16 %v1795_v3, %v1794_v1  ;;  %v1913_v6 = vpack.c.bf16 %v1795_v3, %v1794_v1 }
 0xb90   : > { %3168 = vrot.lane.b32.xlu1 %v3167_v4, %s3362_s25  ;;  %1965 = vmatpush1.bf16.msra.mxu0 %v1913_v6 }
 0xb91   : > { %3193 = vrot.lane.b32.xlu0 %v3172_v58, %s3359_s22  ;;  %1966 = vmatprep.subr.bf16.mxu0 %v3367_v2 }
 0xb94   : > { %3178 = vrot.lane.b32.xlu1 %v3167_v4, %s3361_s24  ;;  %1967 = vmatpush1.bf16.msra.mxu0 %v1912_v7 }
 0xb95   : > { %3203 = vrot.lane.b32.xlu0 %v3172_v58, %s3365_s30  ;;  %1968 = vmatprep.subr.bf16.mxu0 %v3367_v2 }
 0xb98   : > { %3188 = vrot.lane.b32.xlu1 %v3167_v4, %s3359_s22 }
 0xb99   : > { %3213 = vrot.lane.b32.xlu0 %v3172_v58, %s3364_s27 }
 0xb9c   : > { %3198 = vrot.lane.b32.xlu1 %v3167_v4, %s3365_s30 }
 0xb9d   : > { %3223 = vrot.lane.b32.xlu0 %v3172_v58, %s3363_s26 }
 0xba0   : > { %3208 = vrot.lane.b32.xlu1 %v3167_v4, %s3364_s27 }
 0xba1   : > { %1937 = vperm.xlu0 %2845, %v2653_v8  }
 0xba4   : > { %3218 = vrot.lane.b32.xlu1 %v3167_v4, %s3363_s26 }
 0xba5   : > { %1927 = vperm.xlu0 %2845, %v2651_v11  }
 0xba8   : > { %1932 = vperm.xlu1 %2846, %v2652_v12  }
 0xbac   : > { %1922 = vperm.xlu1 %2846, %v2650_v13  }
 0xbfa   : > { %v3174_v18 = vpop.permute.xlu0 %3173 }
 0xbfb   : > { %v3176_v22 = vunpack.i.h.bf16 %v3174_v18  ;;  %v3175_v53 = vunpack.i.l.bf16 %v3174_v18  ;;  %v3342_v18 = vld [vmem:[%s4170_s7 + $0x74] ss:$8 sps:$4 sm:$0xff]  }
 0xbfd   : > { %v2666_v27 = vpack.c.bf16 %v3176_v22, %v3175_v53 }
 0xbfe   : > { %v3184_v30 = vpop.permute.xlu0 %3183 }
 0xbff   : > { %v3186_v31 = vunpack.i.h.bf16 %v3184_v30  ;;  %v3185_v32 = vunpack.i.l.bf16 %v3184_v30 }
 0xc01   : > { %v2676_v36 = vpack.c.bf16 %v3186_v31, %v3185_v32 }
 0xc02   : > { %v3169_v19 = vpop.permute.xlu1 %3168 }
 0xc03   : > { %v3171_v20 = vunpack.i.h.bf16 %v3169_v19  ;;  %v3170_v21 = vunpack.i.l.bf16 %v3169_v19  ;;  %v3194_v39 = vpop.permute.xlu0 %3193  ;;  %v3344_v19 = vld [vmem:[%s4170_s7 + $0x70] ss:$8 sps:$4 sm:$0xff]  }
 0xc04   : > { %v3196_v40 = vunpack.i.h.bf16 %v3194_v39  ;;  %v3195_v41 = vunpack.i.l.bf16 %v3194_v39 }
 0xc05   : > { %v2661_v24 = vpack.c.bf16 %v3171_v20, %v3170_v21 }
 0xc06   : > { %v3179_v25 = vpop.permute.xlu1 %3178  ;;  %v2686_v44 = vpack.c.bf16 %v3196_v40, %v3195_v41 }
 0xc07   : > { %2662 = vmatpush1.bf16.msk.msra.mxu0 %vm3558_vm7, %v2661_v24  ;;  %v3181_v28 = vunpack.i.h.bf16 %v3179_v25  ;;  %v3180_v29 = vunpack.i.l.bf16 %v3179_v25  ;;  %v3204_v47 = vpop.permute.xlu0 %3203 }
 0xc08   : > { %1970 = vmatprep.subr.bf16.mxu0 %v3367_v2  ;;  %v3206_v48 = vunpack.i.h.bf16 %v3204_v47  ;;  %v3205_v50 = vunpack.i.l.bf16 %v3204_v47 }
 0xc09   : > { %v2671_v33 = vpack.c.bf16 %v3181_v28, %v3180_v29 }
 0xc0a   : > { %v3189_v34 = vpop.permute.xlu1 %3188  ;;  %v2692_v55 = vpack.c.bf16 %v3206_v48, %v3205_v50 }
 0xc0b   : > { %2667 = vmatpush1.bf16.msk.msra.mxu0 %vm3558_vm7, %v2666_v27  ;;  %v3191_v37 = vunpack.i.h.bf16 %v3189_v34  ;;  %v3190_v38 = vunpack.i.l.bf16 %v3189_v34  ;;  %v3214_v60 = vpop.permute.xlu0 %3213 }
 0xc0c   : > { %1972 = vmatprep.subr.bf16.mxu0 %v3367_v2  ;;  %v3216_v61 = vunpack.i.h.bf16 %v3214_v60  ;;  %v3215_v63 = vunpack.i.l.bf16 %v3214_v60 }
 0xc0d   : > { %v2681_v42 = vpack.c.bf16 %v3191_v37, %v3190_v38 }
 0xc0e   : > { %v3199_v43 = vpop.permute.xlu1 %3198  ;;  %v2698_v3 = vpack.c.bf16 %v3216_v61, %v3215_v63 }
 0xc0f   : > { %2672 = vmatpush1.bf16.msk.msra.mxu0 %vm3569_vm11, %v2671_v33  ;;  %v3201_v45 = vunpack.i.h.bf16 %v3199_v43  ;;  %v3200_v46 = vunpack.i.l.bf16 %v3199_v43  ;;  %v3224_v7 = vpop.permute.xlu0 %3223 }
 0xc10   : > { %1974 = vmatprep.subr.bf16.mxu0 %v3367_v2  ;;  %v3226_v8 = vunpack.i.h.bf16 %v3224_v7  ;;  %v3225_v11 = vunpack.i.l.bf16 %v3224_v7 }
 0xc11   : > { %v2689_v51 = vpack.c.bf16 %v3201_v45, %v3200_v46  ;;  %v2712_v45 = vld [vmem:[%s4171_s8 + $0x80] sm:$0xff] }
 0xc12   : > { %v3209_v52 = vpop.permute.xlu1 %3208  ;;  %v2704_v13 = vpack.c.bf16 %v3226_v8, %v3225_v11  ;;  %v3347_v46 = vld [vmem:[%s4170_s7 + $0x84] ss:$8 sps:$4 sm:$0xff]  }
 0xc13   : > { %2677 = vmatpush1.bf16.msk.msra.mxu0 %vm3569_vm11, %v2676_v36  ;;  %v3211_v58 = vunpack.i.h.bf16 %v3209_v52  ;;  %v3210_v59 = vunpack.i.l.bf16 %v3209_v52  ;;  %2768 = vmatprep.mubr.msk.bf16.mxu1 %vm1278_vm13, %v3347_v46 }
 0xc14   : > { %1976 = vmatprep.subr.bf16.mxu0 %v3367_v2 }
 0xc15   : > { %v2695_v0 = vpack.c.bf16 %v3211_v58, %v3210_v59 }
 0xc16   : > { %v3219_v1 = vpop.permute.xlu1 %3218 }
 0xc17   : > { %2682 = vmatpush1.bf16.msk.msra.mxu0 %vm3762_vm6, %v2681_v42  ;;  %v3221_v4 = vunpack.i.h.bf16 %v3219_v1  ;;  %v3220_v6 = vunpack.i.l.bf16 %v3219_v1 }
 0xc18   : > { %1978 = vmatprep.subr.bf16.mxu0 %v3367_v2 }
 0xc19   : > { %v2701_v12 = vpack.c.bf16 %v3221_v4, %v3220_v6 }
 0xc1b   : > { %2687 = vmatpush1.bf16.msk.msra.mxu0 %vm3762_vm6, %v2686_v44 }
 0xc1c   : > { %1984 = vmatprep.subr.bf16.mxu0 %v3367_v2  ;;  %v1938_v21 = vpop.permute.xlu0 %1937 }
 0xc1f   : > { %2690 = vmatpush2.bf16.msk.msra.mxu0 %vm3774_vm10, %v2689_v51 }
 0xc20   : > { %1986 = vmatprep.subr.bf16.mxu0 %v3367_v2  ;;  %v1928_v27 = vpop.permute.xlu0 %1927 }
 0xc23   : > { %2693 = vmatpush2.bf16.msk.msra.mxu0 %vm3774_vm10, %v2692_v55  ;;  %v1933_v20 = vpop.permute.xlu1 %1932 }
 0xc24   : > { %1988 = vmatprep.subr.bf16.mxu0 %v3367_v2 }
 0xc27   : > { %2696 = vmatpush2.bf16.msk.msra.mxu0 %vm3581_vm14, %v2695_v0  ;;  %v1923_v53 = vpop.permute.xlu1 %1922 }
 0xc28   : > { %1990 = vmatprep.subr.bf16.mxu0 %v3367_v2 }
 0xc2b   : > { %2699 = vmatpush2.bf16.msk.msra.mxu0 %vm3581_vm14, %v2698_v3 }
 0xc2c   : > { %1992 = vmatprep.subr.bf16.mxu0 %v3367_v2 }
 0xc2f   : > { %2702 = vmatpush2.bf16.msk.msra.mxu0 %vm3542_vm5, %v2701_v12 }
 0xc30   : > { %1994 = vmatprep.subr.bf16.mxu0 %v3367_v2 }
 0xc33   : > { %2705 = vmatpush2.bf16.msk.msra.mxu0 %vm3542_vm5, %v2704_v13 }
 0xc36   : > { %1997 = vmatmul.mubr.bf16.vlgmr.msra.gmra.mxu0 %v3339_v16 }
 0xc37   : > { %2707 = vmatprep.mubr.msk.bf16.mxu0 %vm1278_vm13, %v3342_v18 }
 0xc3e   : > { %2005 = vmatmul.mubr.bf16.gmra.mxu0 %v3344_v19 }
 0xcf6   : > { %v1998_v22 = vpop.f32.mrf.mxu0 }
 0xcf7   : > { %v1999_v25 = vadd.f32 %v1998_v22, %v1923_v53 }
 0xcf8   : > { %v2000_v24 = vpop.f32.mrf.mxu0 }
 0xcf9   : > { %v2013_v31 = vadd.f32 %v1999_v25, %v3884_v14 }
 0xcfa   : > { %v2001_v28 = vpop.f32.mrf.mxu0 }
 0xcfb   : > { %v2002_v29 = vadd.f32 %v2001_v28, %v1928_v27 }
 0xcfc   : > { %v2003_v30 = vpop.f32.mrf.mxu0 }
 0xcfd   : > { %v2014_v32 = vadd.f32 %v2002_v29, %v3887_v15  ;;  %v2715_v15 = vld [vmem:[%s4171_s8 + $0x98] sm:$0xff] }
 0xcfe   : > { %v2006_v33 = vpop.f32.mrf.mxu0 }
 0xcff   : > { %v3232_v34 = vpack.i.bf16 %v2014_v32, %v2013_v31  ;;  %v2007_v37 = vadd.f32 %v2006_v33, %v1933_v20  ;;  %v2133_v14 = vpack.c.bf16 %v2014_v32, %v2013_v31 }
 0xd00   : > { %v2008_v36 = vpop.f32.mrf.mxu0 }
 0xd01   : > { %3233 = vrot.lane.b32.xlu0 %v3232_v34, %s3362_s25  ;;  %v2015_v41 = vadd.f32 %v2007_v37, %v3893_v54  ;;  %v2713_v54 = vld [vmem:[%s4171_s8 + $0x88] sm:$0xff] }
 0xd02   : > { %v2009_v38 = vpop.f32.mrf.mxu0 }
 0xd03   : > { %v2010_v39 = vadd.f32 %v2009_v38, %v1938_v21 }
 0xd04   : > { %v2011_v40 = vpop.f32.mrf.mxu0 }
 0xd05   : > { %v2016_v42 = vadd.f32 %v2010_v39, %v3896_v23  ;;  %3243 = vrot.lane.b32.xlu0 %v3232_v34, %s3361_s24  ;;  %v2714_v23 = vld [vmem:[%s4171_s8 + $0x90] sm:$0xff] }
 0xd07   : > { %v3227_v43 = vpack.i.bf16 %v2016_v42, %v2015_v41  ;;  %v2134_v44 = vpack.c.bf16 %v2016_v42, %v2015_v41 }
 0xd09   : > { %3228 = vrot.lane.b32.xlu1 %v3227_v43, %s3362_s25  ;;  %2186 = vmatpush1.bf16.msra.mxu1 %v2134_v44  ;;  %v3350_v44 = vld [vmem:[%s4170_s7 + $0x90] ss:$8 sps:$4 sm:$0xff]  }
 0xd0a   : > { %3253 = vrot.lane.b32.xlu0 %v3232_v34, %s3359_s22  ;;  %2187 = vmatprep.subr.bf16.mxu1 %v3367_v2 }
 0xd0d   : > { %3238 = vrot.lane.b32.xlu1 %v3227_v43, %s3361_s24  ;;  %2188 = vmatpush1.bf16.msra.mxu1 %v2133_v14 }
 0xd0e   : > { %3263 = vrot.lane.b32.xlu0 %v3232_v34, %s3365_s30  ;;  %2189 = vmatprep.subr.bf16.mxu1 %v3367_v2 }
 0xd11   : > { %3248 = vrot.lane.b32.xlu1 %v3227_v43, %s3359_s22 }
 0xd12   : > { %3273 = vrot.lane.b32.xlu0 %v3232_v34, %s3364_s27 }
 0xd15   : > { %3258 = vrot.lane.b32.xlu1 %v3227_v43, %s3365_s30  ;;  %s378_s30 = scalar_lea.vmem %s4174_s11, %s2386_s21 }
 0xd16   : > { %3283 = vrot.lane.b32.xlu0 %v3232_v34, %s3363_s26 }
 0xd19   : > { %3268 = vrot.lane.b32.xlu1 %v3227_v43, %s3364_s27 }
 0xd1a   : > { %2158 = vperm.xlu0 %2845, %v2715_v15  }
 0xd1d   : > { %3278 = vrot.lane.b32.xlu1 %v3227_v43, %s3363_s26  ;;  %v3345_v43 = vld [vmem:[%s4170_s7 + $0x80] ss:$8 sps:$4 sm:$0xff]  }
 0xd1e   : > { %2148 = vperm.xlu0 %2845, %v2713_v54  }
 0xd21   : > { %2153 = vperm.xlu1 %2846, %v2714_v23  }
 0xd25   : > { %2143 = vperm.xlu1 %2846, %v2712_v45  }
 0xd73   : > { %v3234_v47 = vpop.permute.xlu0 %3233 }
 0xd74   : > { %v3236_v52 = vunpack.i.h.bf16 %v3234_v47  ;;  %v3235_v55 = vunpack.i.l.bf16 %v3234_v47 }
 0xd76   : > { %v2728_v60 = vpack.c.bf16 %v3236_v52, %v3235_v55 }
 0xd77   : > { %v3244_v0 = vpop.permute.xlu0 %3243 }
 0xd78   : > { %v3246_v1 = vunpack.i.h.bf16 %v3244_v0  ;;  %v3245_v3 = vunpack.i.l.bf16 %v3244_v0 }
 0xd7a   : > { %v2738_v7 = vpack.c.bf16 %v3246_v1, %v3245_v3 }
 0xd7b   : > { %v3229_v48 = vpop.permute.xlu1 %3228 }
 0xd7c   : > { %v3231_v50 = vunpack.i.h.bf16 %v3229_v48  ;;  %v3230_v51 = vunpack.i.l.bf16 %v3229_v48  ;;  %v3254_v12 = vpop.permute.xlu0 %3253 }
 0xd7d   : > { %v3256_v13 = vunpack.i.h.bf16 %v3254_v12  ;;  %v3255_v16 = vunpack.i.l.bf16 %v3254_v12 }
 0xd7e   : > { %v2723_v58 = vpack.c.bf16 %v3231_v50, %v3230_v51 }
 0xd7f   : > { %v3239_v59 = vpop.permute.xlu1 %3238  ;;  %v2748_v20 = vpack.c.bf16 %v3256_v13, %v3255_v16 }
 0xd80   : > { %2724 = vmatpush1.bf16.msk.msra.mxu1 %vm3558_vm7, %v2723_v58  ;;  %v3241_v61 = vunpack.i.h.bf16 %v3239_v59  ;;  %v3240_v63 = vunpack.i.l.bf16 %v3239_v59  ;;  %v3264_v53 = vpop.permute.xlu0 %3263 }
 0xd81   : > { %2191 = vmatprep.subr.bf16.mxu1 %v3367_v2  ;;  %v3266_v26 = vunpack.i.h.bf16 %v3264_v53  ;;  %v3265_v24 = vunpack.i.l.bf16 %v3264_v53 }
 0xd82   : > { %v2733_v4 = vpack.c.bf16 %v3241_v61, %v3240_v63 }
 0xd83   : > { %v3249_v6 = vpop.permute.xlu1 %3248  ;;  %v2754_v28 = vpack.c.bf16 %v3266_v26, %v3265_v24 }
 0xd84   : > { %2729 = vmatpush1.bf16.msk.msra.mxu1 %vm3558_vm7, %v2728_v60  ;;  %v3251_v8 = vunpack.i.h.bf16 %v3249_v6  ;;  %v3250_v11 = vunpack.i.l.bf16 %v3249_v6  ;;  %v3274_v31 = vpop.permute.xlu0 %3273  ;;  %v3373_v60 = vmov 0.0  }
 0xd85   : > { %2193 = vmatprep.subr.bf16.mxu1 %v3367_v2  ;;  %v3276_v49 = vunpack.i.h.bf16 %v3274_v31  ;;  %v3275_v32 = vunpack.i.l.bf16 %v3274_v31  ;;  %2805 = vmatprep.subr.bf16.mxu0 %v3373_v60 }
 0xd86   : > { %v2743_v18 = vpack.c.bf16 %v3251_v8, %v3250_v11 }
 0xd87   : > { %v3259_v19 = vpop.permute.xlu1 %3258  ;;  %v2760_v36 = vpack.c.bf16 %v3276_v49, %v3275_v32 }
 0xd88   : > { %2734 = vmatpush1.bf16.msk.msra.mxu1 %vm3569_vm11, %v2733_v4  ;;  %v3261_v21 = vunpack.i.h.bf16 %v3259_v19  ;;  %v3260_v22 = vunpack.i.l.bf16 %v3259_v19  ;;  %v3284_v39 = vpop.permute.xlu0 %3283 }
 0xd89   : > { %2195 = vmatprep.subr.bf16.mxu1 %v3367_v2  ;;  %v3286_v62 = vunpack.i.h.bf16 %v3284_v39  ;;  %v3285_v40 = vunpack.i.l.bf16 %v3284_v39 }
 0xd8a   : > { %v2751_v25 = vpack.c.bf16 %v3261_v21, %v3260_v22 }
 0xd8b   : > { %v3269_v27 = vpop.permute.xlu1 %3268  ;;  %v2766_v42 = vpack.c.bf16 %v3286_v62, %v3285_v40 }
 0xd8c   : > { %2739 = vmatpush1.bf16.msk.msra.mxu1 %vm3569_vm11, %v2738_v7  ;;  %v3271_v29 = vunpack.i.h.bf16 %v3269_v27  ;;  %v3270_v30 = vunpack.i.l.bf16 %v3269_v27  ;;  %v2239_v7 = vld [vmem:[%s4173_s10] sm:$0xf]  ;;  %vm3374_vm11 = vmmov 0  }
 0xd8d   : > { %2197 = vmatprep.subr.bf16.mxu1 %v3367_v2  ;;  %2817 = vmatprep.mubr.msk.bf16.mxu0 %vm3374_vm11, %v3373_v60 }
 0xd8e   : > { %v2757_v33 = vpack.c.bf16 %v3271_v29, %v3270_v30 }
 0xd8f   : > { %v3279_v34 = vpop.permute.xlu1 %3278 }
 0xd90   : > { %2744 = vmatpush1.bf16.msk.msra.mxu1 %vm3762_vm6, %v2743_v18  ;;  %v3281_v37 = vunpack.i.h.bf16 %v3279_v34  ;;  %v3280_v38 = vunpack.i.l.bf16 %v3279_v34 }
 0xd91   : > { %2199 = vmatprep.subr.bf16.mxu1 %v3367_v2 }
 0xd92   : > { %v2763_v41 = vpack.c.bf16 %v3281_v37, %v3280_v38 }
 0xd94   : > { %2749 = vmatpush1.bf16.msk.msra.mxu1 %vm3762_vm6, %v2748_v20 }
 0xd95   : > { %2205 = vmatprep.subr.bf16.mxu1 %v3367_v2  ;;  %v2159_v14 = vpop.permute.xlu0 %2158 }
 0xd98   : > { %2752 = vmatpush2.bf16.msk.msra.mxu1 %vm3774_vm10, %v2751_v25 }
 0xd99   : > { %2207 = vmatprep.subr.bf16.mxu1 %v3367_v2  ;;  %v2149_v46 = vpop.permute.xlu0 %2148 }
 0xd9c   : > { %2755 = vmatpush2.bf16.msk.msra.mxu1 %vm3774_vm10, %v2754_v28 }
 0xd9d   : > { %2209 = vmatprep.subr.bf16.mxu1 %v3367_v2 }
 0xda0   : > { %2758 = vmatpush2.bf16.msk.msra.mxu1 %vm3581_vm14, %v2757_v33 }
 0xda1   : > { %2211 = vmatprep.subr.bf16.mxu1 %v3367_v2 }
 0xda4   : > { %2761 = vmatpush2.bf16.msk.msra.mxu1 %vm3581_vm14, %v2760_v36 }
 0xda5   : > { %2213 = vmatprep.subr.bf16.mxu1 %v3367_v2 }
 0xda8   : > { %2764 = vmatpush2.bf16.msk.msra.mxu1 %vm3542_vm5, %v2763_v41 }
 0xda9   : > { %2215 = vmatprep.subr.bf16.mxu1 %v3367_v2  ;;  %v2154_v2 = vpop.permute.xlu1 %2153 }
 0xdac   : > { %2767 = vmatpush2.bf16.msk.msra.mxu1 %vm3542_vm5, %v2766_v42 }
 0xdad   : > { %v2144_v54 = vpop.permute.xlu1 %2143 }
 0xdaf   : > { %2218 = vmatmul.mubr.bf16.vlgmr.msra.gmra.mxu1 %v3345_v43 }
 0xdb0   : > { %2769 = vmatprep.mubr.msk.bf16.mxu1 %vm1278_vm13, %v3348_v35 }
 0xdb7   : > { %2226 = vmatmul.mubr.bf16.gmra.mxu1 %v3350_v44 }
 0xe6f   : > { %v2219_v15 = vpop.f32.mrf.mxu1 }
 0xe70   : > { %v2220_v45 = vadd.f32 %v2219_v15, %v2144_v54 }
 0xe71   : > { %v2221_v23 = vpop.f32.mrf.mxu1 }
 0xe72   : > { %v2234_v51 = vadd.f32 %v2220_v45, %v3701_v9 }
 0xe73   : > { %v2222_v47 = vpop.f32.mrf.mxu1 }
 0xe74   : > { %v2223_v48 = vadd.f32 %v2222_v47, %v2149_v46 }
 0xe75   : > { %v2224_v50 = vpop.f32.mrf.mxu1 }
 0xe76   : > { %v2235_v52 = vadd.f32 %v2223_v48, %v3704_v10 }
 0xe77   : > { %v2227_v55 = vpop.f32.mrf.mxu1 }
 0xe78   : > { %v3292_v58 = vpack.i.bf16 %v2235_v52, %v2234_v51  ;;  %v2278_v59 = vpack.c.bf16 %v2235_v52, %v2234_v51  ;;  %v2228_v63 = vadd.f32 %v2227_v55, %v2154_v2 }
 0xe79   : > { %v2229_v61 = vpop.f32.mrf.mxu1 }
 0xe7a   : > { %3293 = vrot.lane.b32.xlu0 %v3292_v58, %s3363_s26  ;;  %v2236_v4 = vadd.f32 %v2228_v63, %v3710_v56 }
 0xe7b   : > { %v2230_v0 = vpop.f32.mrf.mxu1 }
 0xe7c   : > { %v2231_v1 = vadd.f32 %v2230_v0, %v2159_v14 }
 0xe7d   : > { %v2232_v3 = vpop.f32.mrf.mxu1 }
 0xe7e   : > { %v2237_v6 = vadd.f32 %v2231_v1, %v3713_v57  ;;  %3303 = vrot.lane.b32.xlu0 %v3292_v58, %s3362_s25 }
 0xe80   : > { %v3287_v9 = vpack.i.bf16 %v2237_v6, %v2236_v4  ;;  %v2279_v10 = vpack.c.bf16 %v2237_v6, %v2236_v4 }
 0xe82   : > { %3288 = vrot.lane.b32.xlu1 %v3287_v9, %s3363_s26 }
 0xe86   : > { %3298 = vrot.lane.b32.xlu1 %v3287_v9, %s3362_s25 }
 0xe8a   : > { %2284 = vperm.xlu1 %2846, %v2239_v7  }
 0xeec   : > { %v3294_v8 = vpop.permute.xlu0 %3293 }
 0xeed   : > { %v3296_v57 = vunpack.i.h.bf16 %v3294_v8  ;;  %v3295_v13 = vunpack.i.l.bf16 %v3294_v8 }
 0xeef   : > { %v2774_v18 = vpack.c.bf16 %v3296_v57, %v3295_v13 }
 0xef0   : > { %v3304_v22 = vpop.permute.xlu0 %3303 }
 0xef1   : > { %v3306_v53 = vunpack.i.h.bf16 %v3304_v22  ;;  %v3305_v26 = vunpack.i.l.bf16 %v3304_v22 }
 0xef3   : > { %v2784_v25 = vpack.c.bf16 %v3306_v53, %v3305_v26 }
 0xef4   : > { %v3289_v11 = vpop.permute.xlu1 %3288 }
 0xef5   : > { %v3291_v56 = vunpack.i.h.bf16 %v3289_v11  ;;  %v3290_v12 = vunpack.i.l.bf16 %v3289_v11 }
 0xef7   : > { %v2771_v16 = vpack.c.bf16 %v3291_v56, %v3290_v12 }
 0xef8   : > { %v3299_v19 = vpop.permute.xlu1 %3298 }
 0xef9   : > { %2806 = vmatpush3.bf16.msk.msra.mxu0 %vm3542_vm5, %v2771_v16  ;;  %v3301_v20 = vunpack.i.h.bf16 %v3299_v19  ;;  %v3300_v21 = vunpack.i.l.bf16 %v3299_v19 }
 0xefa   : > { %2807 = vmatprep.subr.bf16.mxu0 %v3373_v60 }
 0xefb   : > { %v2779_v24 = vpack.c.bf16 %v3301_v20, %v3300_v21 }
 0xefd   : > { %2808 = vmatpush3.bf16.msk.msra.mxu0 %vm3542_vm5, %v2774_v18 }
 0xefe   : > { %2809 = vmatprep.subr.bf16.mxu0 %v3373_v60 }
 0xf01   : > { %2810 = vmatpush3.bf16.msra.mxu0 %v2279_v10 }
 0xf02   : > { %2811 = vmatprep.subr.bf16.mxu0 %v3373_v60 }
 0xf05   : > { %2812 = vmatpush3.bf16.msra.mxu0 %v2278_v59  ;;  %v2285_v27 = vpop.permute.xlu1 %2284 }
 0xf06   : > { %2813 = vmatprep.subr.bf16.mxu0 %v3373_v60 }
 0xf09   : > { %2814 = vmatpush3.bf16.msk.msra.mxu0 %vm3558_vm7, %v2779_v24 }
 0xf0a   : > { %2815 = vmatprep.subr.bf16.mxu0 %v3373_v60 }
 0xf0d   : > { %2816 = vmatpush3.bf16.msk.msra.mxu0 %vm3558_vm7, %v2784_v25 }
 0xf10   : > { %2818 = vmatmul.mubr.msk.bf16.vlgmr.msra.gmra.mxu0 %vm1278_vm13, %v2238_v5 }
 0xfd0   : > { %v2324_v28 = vpop.f32.mrf.mxu0 }
 0xfd1   : > { %v2325_v29 = vadd.f32 %v2324_v28, %v2285_v27 }
 0xfd2   : > { %v2819_v30 = vpop.f32.mrf.mxu0 }
 0xfd3   : > { %2330 = vst [vmem:[%s378_s30] sm:$0xf] %v2325_v29 }
 0xfd4   : > { %v2327_v31 = vpop.f32.mrf.mxu0 }
 0xfd6   : > { %v2820_v49 = vpop.f32.mrf.mxu0 }
 0xfd7 PF: > { %s21_s17 = sadd.s32 1, %s3357_s17  }
 0xfd8   : > { %p18_p4 = scmp.ge.s32.totalorder %s21_s17, 4  }
 0xfda   :  { %20 = sbr.rel (!%p18_p4) target bundleno = 1 (0x1), region = 102 }

</bundles_post_ra>
